<compile_context>
chip_gen: v5e
topology: v5e:2x2
jax: 0.10.0
libtpu: 0.0.40
codegen_flags: <defaults>
</compile_context>

<pallas_src>
import jax
import jax.numpy as jnp
from jax.experimental import pallas as pl
from jax.experimental.pallas import tpu as pltpu

EPS = 1e-5          # PyTorch BatchNorm1d default eps
HP = 128            # lane-padded hidden width (real hidden = 32)
VMEM_LIMIT = 32 * 1024 * 1024


def _bn_relu_f32(h, gamma, beta):
    """Training-mode BatchNorm1d (biased variance) + ReLU, all in f32."""
    mean = jnp.mean(h, axis=0, keepdims=True)
    var = jnp.mean((h - mean) ** 2, axis=0, keepdims=True)
    hn = (h - mean) * jax.lax.rsqrt(var + EPS)
    return jnp.maximum(hn * gamma + beta, 0.0)


# ----------------------------------------------------------------------------
# Kernel 1: one RGCNConv layer fused with BatchNorm1d (training stats) + ReLU.
# Single invocation (no grid): everything VMEM resident, relation loop unrolled.
# ----------------------------------------------------------------------------
def rgcn_bn_relu_kernel(a_ref, x_ref, wflat_ref, root_ref, bias_ref,
                        gamma_ref, beta_ref, o_ref):
    num_rel = a_ref.shape[0]
    hp = o_ref.shape[1]

    x_bf = x_ref[...]                                    # (N, Cin) bf16

    # self / root term (f32 accumulator)
    acc = jnp.dot(x_bf, root_ref[...],
                  preferred_element_type=jnp.float32) + bias_ref[...]

    # one wide matmul for ALL relations: (N, Cin) @ (Cin, R*Hp)  -> fills MXU lanes
    xw_all = jnp.dot(x_bf, wflat_ref[...], preferred_element_type=jnp.float32)
    xw_all_bf = xw_all.astype(jnp.bfloat16)

    # unrolled (static R) aggregation:  acc += A[r] @ (x @ W[r])
    for r in range(num_rel):
        xw_r = xw_all_bf[:, r * hp:(r + 1) * hp]         # lane-aligned slice
        acc = acc + jnp.dot(a_ref[r], xw_r, preferred_element_type=jnp.float32)

    # fused BatchNorm (training batch stats) + ReLU, f32
    o_ref[...] = _bn_relu_f32(acc, gamma_ref[...], beta_ref[...]).astype(o_ref.dtype)


def rgcn_layer(x_bf, a_bf, w_flat, root, bias, gamma, beta):
    # x_bf: (N, Cin) bf16   a_bf: (R, N, N) bf16   w_flat: (Cin, R*Hp) bf16
    # root: (Cin, Hp) bf16  bias/gamma/beta: (1, Hp) f32
    n = x_bf.shape[0]
    hp = root.shape[1]
    return pl.pallas_call(
        rgcn_bn_relu_kernel,
        out_shape=jax.ShapeDtypeStruct((n, hp), jnp.float32),
        compiler_params=pltpu.CompilerParams(vmem_limit_bytes=VMEM_LIMIT),
    )(a_bf, x_bf, w_flat, root, bias, gamma, beta)


# ----------------------------------------------------------------------------
# Kernel 2: decode MLP head (lane-dense, bf16 matmuls, f32 BN)
#   bn_pool -> relu -> fc1 -> bn3 -> relu -> fc2 -> bn4 -> relu -> fc3 -> bn5
#   -> relu -> fc4 -> bn6 -> relu -> fc5
# Output is a lane-dense (E, 128) slab; the wrapper slices column 0.
# ----------------------------------------------------------------------------
def decode_mlp_kernel(p_ref,
                      g_pool, b_pool,
                      w1, b1, g3, be3,
                      w2, b2, g4, be4,
                      w3, b3, g5, be5,
                      w4, b4, g6, be6,
                      w5, b5,
                      o_ref):
    def linear(h_f32, w, b):
        return jnp.dot(h_f32.astype(jnp.bfloat16), w[...],
                       preferred_element_type=jnp.float32) + b[...]

    h = _bn_relu_f32(p_ref[...].astype(jnp.float32), g_pool[...], b_pool[...])
    h = _bn_relu_f32(linear(h, w1, b1), g3[...], be3[...])
    h = _bn_relu_f32(linear(h, w2, b2), g4[...], be4[...])
    h = _bn_relu_f32(linear(h, w3, b3), g5[...], be5[...])
    h = _bn_relu_f32(linear(h, w4, b4), g6[...], be6[...])
    o_ref[...] = linear(h, w5, b5).astype(o_ref.dtype)


def decode_mlp(pooled, params, out_width):
    e = pooled.shape[0]
    return pl.pallas_call(
        decode_mlp_kernel,
        out_shape=jax.ShapeDtypeStruct((e, out_width), jnp.float32),
        compiler_params=pltpu.CompilerParams(vmem_limit_bytes=VMEM_LIMIT),
    )(pooled, *params)


# ----------------------------------------------------------------------------
# Parameter construction (zero-padded to lane-dense widths, weights in bf16)
# ----------------------------------------------------------------------------
def make_params(key, in_channels, hidden, num_relations, num_bases=30, hp=HP):
    ks = jax.random.split(key, 16)

    def nrm(k, shape, scale=0.1):
        return (scale * jax.random.normal(k, shape)).astype(jnp.float32)

    def pad2(a, rows, cols):
        return jnp.pad(a, ((0, rows - a.shape[0]), (0, cols - a.shape[1])))

    p = {}
    # conv1 (basis decomposition) and conv2.  Layer-2 input width is the padded hp
    # (real data lives in the first `hidden` channels, the rest are exact zeros).
    layer_cfg = [("1", in_channels, in_channels), ("2", hidden, hp)]
    for idx, (tag, cin_real, cin_pad) in enumerate(layer_cfg):
        kb, kc, kr = jax.random.split(ks[idx], 3)
        bases = nrm(kb, (num_bases, cin_real, hidden))
        comp = nrm(kc, (num_relations, num_bases))
        w = jnp.einsum("rb,bio->rio", comp, bases)            # (R, cin_real, hidden)
        w = jnp.pad(w, ((0, 0), (0, cin_pad - cin_real), (0, hp - hidden)))
        # flatten relations along lanes: (cin_pad, R*hp), lane-block r == W[r]
        p[f"Wflat{tag}"] = (w.transpose(1, 0, 2)
                             .reshape(cin_pad, num_relations * hp)
                             .astype(jnp.bfloat16))
        p[f"root{tag}"] = pad2(nrm(kr, (cin_real, hidden)), cin_pad, hp).astype(jnp.bfloat16)
        p[f"bias{tag}"] = jnp.zeros((1, hp), jnp.float32)
        # gamma is zero-padded so padded lanes stay exactly zero after BN+affine
        p[f"bn{tag}_g"] = jnp.pad(jnp.ones((1, hidden), jnp.float32),
                                  ((0, 0), (0, hp - hidden)))
        p[f"bn{tag}_b"] = jnp.zeros((1, hp), jnp.float32)

    # decode head: real dims [hidden, 512, 256, 128, 64, 1] -> lane-padded
    dims_real = [hidden, 512, 256, 128, 64, 1]
    dims_pad = [hp, 512, 256, 128, 128, 128]
    p["bn_pool_g"] = jnp.pad(jnp.ones((1, hidden), jnp.float32),
                             ((0, 0), (0, hp - hidden)))
    p["bn_pool_b"] = jnp.zeros((1, hp), jnp.float32)
    for i in range(5):
        w = nrm(ks[4 + i], (dims_real[i], dims_real[i + 1]))
        p[f"fcw{i+1}"] = pad2(w, dims_pad[i], dims_pad[i + 1]).astype(jnp.bfloat16)
        p[f"fcb{i+1}"] = jnp.zeros((1, dims_pad[i + 1]), jnp.float32)
    bn_real = [512, 256, 128, 64]
    bn_pad = [512, 256, 128, 128]
    for i in range(4):
        p[f"bn{i+3}_g"] = jnp.pad(jnp.ones((1, bn_real[i]), jnp.float32),
                                  ((0, 0), (0, bn_pad[i] - bn_real[i])))
        p[f"bn{i+3}_b"] = jnp.zeros((1, bn_pad[i]), jnp.float32)
    return p


def build_rel_adjacency(edge_index, edge_type, num_nodes, num_relations):
    # A[r, dst, src] = count / max(in_degree_r(dst), 1)   (RGCNConv aggr='mean')
    src, dst = edge_index[0], edge_index[1]
    A = jnp.zeros((num_relations, num_nodes, num_nodes), jnp.float32)
    A = A.at[edge_type, dst, src].add(1.0)
    deg = jnp.sum(A, axis=2, keepdims=True)
    return A / jnp.maximum(deg, 1.0)


# ----------------------------------------------------------------------------
# Full forward
# ----------------------------------------------------------------------------
def rgcn_lp_forward(params, x, edge_index, edge_type, edge_label_index,
                    num_relations, hidden, hp=HP):
    n = x.shape[0]
    # TODO(synk): dense A only for small graphs; use CSR scalar-prefetch gather at scale.
    A = build_rel_adjacency(edge_index, edge_type, n, num_relations).astype(jnp.bfloat16)

    # encode: two fused RGCNConv + BN + ReLU Pallas kernels (bf16 MXU, f32 BN)
    z = rgcn_layer(x.astype(jnp.bfloat16), A, params["Wflat1"], params["root1"],
                   params["bias1"], params["bn1_g"], params["bn1_b"])
    z = rgcn_layer(z.astype(jnp.bfloat16), A, params["Wflat2"], params["root2"],
                   params["bias2"], params["bn2_g"], params["bn2_b"])

    # decode glue: gather endpoints, concat, AvgPool1d(kernel_size=2), lane-pad.
    z_real = z[:, :hidden]                               # strip lane padding
    src_feat = z_real[edge_label_index[0]]               # (E_lp, H)
    dst_feat = z_real[edge_label_index[1]]               # (E_lp, H)
    combined = jnp.concatenate([src_feat, dst_feat], axis=-1)       # (E_lp, 2H)
    e_lp = combined.shape[0]
    pooled = combined.reshape(e_lp, hidden, 2).mean(axis=-1)        # AvgPool1d(k=2)
    pooled = jnp.pad(pooled, ((0, 0), (0, hp - hidden)))            # lane-dense input

    mlp_params = (
        params["bn_pool_g"], params["bn_pool_b"],
        params["fcw1"], params["fcb1"], params["bn3_g"], params["bn3_b"],
        params["fcw2"], params["fcb2"], params["bn4_g"], params["bn4_b"],
        params["fcw3"], params["fcb3"], params["bn5_g"], params["bn5_b"],
        params["fcw4"], params["fcb4"], params["bn6_g"], params["bn6_b"],
        params["fcw5"], params["fcb5"],
    )
    out_slab = decode_mlp(pooled, mlp_params, out_width=hp)   # lane-dense (E_lp, 128)
    return out_slab[:, :1]                                     # logits (E_lp, 1)


if __name__ == "__main__":
    # Small, deterministic synthetic problem.
    N = 32            # num nodes
    IN_CH = 16        # in_channels
    HID = 32          # hidden_channels
    R = 4             # num_relations
    E = 96            # num edges
    E_LP = 16         # num edges to score

    key = jax.random.PRNGKey(0)
    k_x, k_ei, k_et, k_eli, k_p = jax.random.split(key, 5)

    x = jax.random.normal(k_x, (N, IN_CH), jnp.float32)
    edge_index = jax.random.randint(k_ei, (2, E), 0, N, jnp.int32)
    edge_type = jax.random.randint(k_et, (E,), 0, R, jnp.int32)
    edge_label_index = jax.random.randint(k_eli, (2, E_LP), 0, N, jnp.int32)

    params = make_params(k_p, IN_CH, HID, R, num_bases=30)

    fwd = jax.jit(
        lambda p, xx, ei, et, eli: rgcn_lp_forward(p, xx, ei, et, eli, R, HID)
    )
    out = fwd(params, x, edge_index, edge_type, edge_label_index)
    out = jax.block_until_ready(out)

    assert out.shape == (E_LP, 1), out.shape
    assert bool(jnp.all(jnp.isfinite(out)))
    print("KERNEL_OK")
</pallas_src>

<mosaic_0001>
module attributes {stable_mosaic.version = 11 : i64} {
  func.func @rgcn_bn_relu_kernel(%arg0: memref<4x32x32xbf16, #tpu.memory_space<vmem>>, %arg1: memref<32x16xbf16, #tpu.memory_space<vmem>>, %arg2: memref<16x512xbf16, #tpu.memory_space<vmem>>, %arg3: memref<16x128xbf16, #tpu.memory_space<vmem>>, %arg4: memref<1x128xf32, #tpu.memory_space<vmem>>, %arg5: memref<1x128xf32, #tpu.memory_space<vmem>>, %arg6: memref<1x128xf32, #tpu.memory_space<vmem>>, %arg7: memref<32x128xf32, #tpu.memory_space<vmem>>) attributes {dimension_semantics = [], scalar_prefetch = 0 : i64, scratch_operands = 0 : i64, tpu.core_type = #tpu.core_type<tc>} {
    %c0 = arith.constant 0 : index
    %c0_0 = arith.constant 0 : index
    %0 = vector.load %arg1[%c0, %c0_0] : memref<32x16xbf16, #tpu.memory_space<vmem>>, vector<32x16xbf16>
    %c0_1 = arith.constant 0 : index
    %c0_2 = arith.constant 0 : index
    %1 = vector.load %arg3[%c0_1, %c0_2] : memref<16x128xbf16, #tpu.memory_space<vmem>>, vector<16x128xbf16>
    %cst = arith.constant dense<0.000000e+00> : vector<32x128xf32>
    %2 = tpu.matmul %0, %1, %cst {dimension_numbers = #tpu.dot_dimension_numbers<[1], [0], [0], [1], [0, 0, 1, 1], [], []>} : vector<32x16xbf16>, vector<16x128xbf16>, vector<32x128xf32> -> vector<32x128xf32>
    %c0_3 = arith.constant 0 : index
    %c0_4 = arith.constant 0 : index
    %3 = vector.load %arg4[%c0_3, %c0_4] : memref<1x128xf32, #tpu.memory_space<vmem>>, vector<1x128xf32>
    %4 = vector.broadcast %3 : vector<1x128xf32> to vector<32x128xf32>
    %5 = arith.addf %2, %4 : vector<32x128xf32>
    %c0_5 = arith.constant 0 : index
    %c0_6 = arith.constant 0 : index
    %6 = vector.load %arg2[%c0_5, %c0_6] : memref<16x512xbf16, #tpu.memory_space<vmem>>, vector<16x512xbf16>
    %cst_7 = arith.constant dense<0.000000e+00> : vector<32x512xf32>
    %7 = tpu.matmul %0, %6, %cst_7 {dimension_numbers = #tpu.dot_dimension_numbers<[1], [0], [0], [1], [0, 0, 1, 1], [], []>} : vector<32x16xbf16>, vector<16x512xbf16>, vector<32x512xf32> -> vector<32x512xf32>
    %8 = arith.truncf %7 : vector<32x512xf32> to vector<32x512xbf16>
    %9 = vector.extract_strided_slice %8 {offsets = [0, 0], sizes = [32, 128], strides = [1, 1]} : vector<32x512xbf16> to vector<32x128xbf16>
    %c0_8 = arith.constant 0 : index
    %c0_9 = arith.constant 0 : index
    %c0_10 = arith.constant 0 : index
    %10 = vector.load %arg0[%c0_8, %c0_9, %c0_10] : memref<4x32x32xbf16, #tpu.memory_space<vmem>>, vector<1x32x32xbf16>
    %11 = vector.shape_cast %10 : vector<1x32x32xbf16> to vector<32x32xbf16>
    %cst_11 = arith.constant dense<0.000000e+00> : vector<32x128xf32>
    %12 = tpu.matmul %11, %9, %cst_11 {dimension_numbers = #tpu.dot_dimension_numbers<[1], [0], [0], [1], [0, 0, 1, 1], [], []>} : vector<32x32xbf16>, vector<32x128xbf16>, vector<32x128xf32> -> vector<32x128xf32>
    %13 = arith.addf %5, %12 : vector<32x128xf32>
    %14 = vector.extract_strided_slice %8 {offsets = [0, 128], sizes = [32, 128], strides = [1, 1]} : vector<32x512xbf16> to vector<32x128xbf16>
    %c1 = arith.constant 1 : index
    %c0_12 = arith.constant 0 : index
    %c0_13 = arith.constant 0 : index
    %15 = vector.load %arg0[%c1, %c0_12, %c0_13] : memref<4x32x32xbf16, #tpu.memory_space<vmem>>, vector<1x32x32xbf16>
    %16 = vector.shape_cast %15 : vector<1x32x32xbf16> to vector<32x32xbf16>
    %cst_14 = arith.constant dense<0.000000e+00> : vector<32x128xf32>
    %17 = tpu.matmul %16, %14, %cst_14 {dimension_numbers = #tpu.dot_dimension_numbers<[1], [0], [0], [1], [0, 0, 1, 1], [], []>} : vector<32x32xbf16>, vector<32x128xbf16>, vector<32x128xf32> -> vector<32x128xf32>
    %18 = arith.addf %13, %17 : vector<32x128xf32>
    %19 = vector.extract_strided_slice %8 {offsets = [0, 256], sizes = [32, 128], strides = [1, 1]} : vector<32x512xbf16> to vector<32x128xbf16>
    %c2 = arith.constant 2 : index
    %c0_15 = arith.constant 0 : index
    %c0_16 = arith.constant 0 : index
    %20 = vector.load %arg0[%c2, %c0_15, %c0_16] : memref<4x32x32xbf16, #tpu.memory_space<vmem>>, vector<1x32x32xbf16>
    %21 = vector.shape_cast %20 : vector<1x32x32xbf16> to vector<32x32xbf16>
    %cst_17 = arith.constant dense<0.000000e+00> : vector<32x128xf32>
    %22 = tpu.matmul %21, %19, %cst_17 {dimension_numbers = #tpu.dot_dimension_numbers<[1], [0], [0], [1], [0, 0, 1, 1], [], []>} : vector<32x32xbf16>, vector<32x128xbf16>, vector<32x128xf32> -> vector<32x128xf32>
    %23 = arith.addf %18, %22 : vector<32x128xf32>
    %24 = vector.extract_strided_slice %8 {offsets = [0, 384], sizes = [32, 128], strides = [1, 1]} : vector<32x512xbf16> to vector<32x128xbf16>
    %c3 = arith.constant 3 : index
    %c0_18 = arith.constant 0 : index
    %c0_19 = arith.constant 0 : index
    %25 = vector.load %arg0[%c3, %c0_18, %c0_19] : memref<4x32x32xbf16, #tpu.memory_space<vmem>>, vector<1x32x32xbf16>
    %26 = vector.shape_cast %25 : vector<1x32x32xbf16> to vector<32x32xbf16>
    %cst_20 = arith.constant dense<0.000000e+00> : vector<32x128xf32>
    %27 = tpu.matmul %26, %24, %cst_20 {dimension_numbers = #tpu.dot_dimension_numbers<[1], [0], [0], [1], [0, 0, 1, 1], [], []>} : vector<32x32xbf16>, vector<32x128xbf16>, vector<32x128xf32> -> vector<32x128xf32>
    %28 = arith.addf %23, %27 : vector<32x128xf32>
    %c0_21 = arith.constant 0 : index
    %c0_22 = arith.constant 0 : index
    %29 = vector.load %arg5[%c0_21, %c0_22] : memref<1x128xf32, #tpu.memory_space<vmem>>, vector<1x128xf32>
    %c0_23 = arith.constant 0 : index
    %c0_24 = arith.constant 0 : index
    %30 = vector.load %arg6[%c0_23, %c0_24] : memref<1x128xf32, #tpu.memory_space<vmem>>, vector<1x128xf32>
    %cst_25 = arith.constant dense<0.000000e+00> : vector<128xf32>
    %31 = vector.multi_reduction <add>, %28, %cst_25 [0] : vector<32x128xf32> to vector<128xf32>
    %32 = vector.shape_cast %31 : vector<128xf32> to vector<1x128xf32>
    %cst_26 = arith.constant 3.200000e+01 : f32
    %33 = vector.broadcast %cst_26 : f32 to vector<1x128xf32>
    %34 = arith.divf %32, %33 : vector<1x128xf32>
    %35 = vector.broadcast %34 : vector<1x128xf32> to vector<32x128xf32>
    %36 = arith.subf %28, %35 : vector<32x128xf32>
    %37 = arith.mulf %36, %36 : vector<32x128xf32>
    %cst_27 = arith.constant dense<0.000000e+00> : vector<128xf32>
    %38 = vector.multi_reduction <add>, %37, %cst_27 [0] : vector<32x128xf32> to vector<128xf32>
    %39 = vector.shape_cast %38 : vector<128xf32> to vector<1x128xf32>
    %cst_28 = arith.constant 3.200000e+01 : f32
    %40 = vector.broadcast %cst_28 : f32 to vector<1x128xf32>
    %41 = arith.divf %39, %40 : vector<1x128xf32>
    %42 = vector.broadcast %34 : vector<1x128xf32> to vector<32x128xf32>
    %43 = arith.subf %28, %42 : vector<32x128xf32>
    %cst_29 = arith.constant 9.99999974E-6 : f32
    %44 = vector.broadcast %cst_29 : f32 to vector<1x128xf32>
    %45 = arith.addf %41, %44 : vector<1x128xf32>
    %46 = math.rsqrt %45 : vector<1x128xf32>
    %47 = vector.broadcast %46 : vector<1x128xf32> to vector<32x128xf32>
    %48 = arith.mulf %43, %47 : vector<32x128xf32>
    %49 = vector.broadcast %29 : vector<1x128xf32> to vector<32x128xf32>
    %50 = arith.mulf %48, %49 : vector<32x128xf32>
    %51 = vector.broadcast %30 : vector<1x128xf32> to vector<32x128xf32>
    %52 = arith.addf %50, %51 : vector<32x128xf32>
    %cst_30 = arith.constant 0.000000e+00 : f32
    %53 = vector.broadcast %cst_30 : f32 to vector<32x128xf32>
    %54 = arith.maximumf %52, %53 : vector<32x128xf32>
    %c0_31 = arith.constant 0 : index
    %c0_32 = arith.constant 0 : index
    %55 = vector.load %arg7[%c0_31, %c0_32] : memref<32x128xf32, #tpu.memory_space<vmem>>, vector<32x128xf32>
    tpu.vector_store %arg7[%c0_31, %c0_32], %54 {strides = array<i32>} : memref<32x128xf32, #tpu.memory_space<vmem>>, vector<32x128xf32>,
    return
  }
}

module attributes {stable_mosaic.version = 11 : i64} {
  func.func @rgcn_bn_relu_kernel(%arg0: memref<4x32x32xbf16, #tpu.memory_space<vmem>>, %arg1: memref<32x128xbf16, #tpu.memory_space<vmem>>, %arg2: memref<128x512xbf16, #tpu.memory_space<vmem>>, %arg3: memref<128x128xbf16, #tpu.memory_space<vmem>>, %arg4: memref<1x128xf32, #tpu.memory_space<vmem>>, %arg5: memref<1x128xf32, #tpu.memory_space<vmem>>, %arg6: memref<1x128xf32, #tpu.memory_space<vmem>>, %arg7: memref<32x128xf32, #tpu.memory_space<vmem>>) attributes {dimension_semantics = [], scalar_prefetch = 0 : i64, scratch_operands = 0 : i64, tpu.core_type = #tpu.core_type<tc>} {
    %c0 = arith.constant 0 : index
    %c0_0 = arith.constant 0 : index
    %0 = vector.load %arg1[%c0, %c0_0] : memref<32x128xbf16, #tpu.memory_space<vmem>>, vector<32x128xbf16>
    %c0_1 = arith.constant 0 : index
    %c0_2 = arith.constant 0 : index
    %1 = vector.load %arg3[%c0_1, %c0_2] : memref<128x128xbf16, #tpu.memory_space<vmem>>, vector<128x128xbf16>
    %cst = arith.constant dense<0.000000e+00> : vector<32x128xf32>
    %2 = tpu.matmul %0, %1, %cst {dimension_numbers = #tpu.dot_dimension_numbers<[1], [0], [0], [1], [0, 0, 1, 1], [], []>} : vector<32x128xbf16>, vector<128x128xbf16>, vector<32x128xf32> -> vector<32x128xf32>
    %c0_3 = arith.constant 0 : index
    %c0_4 = arith.constant 0 : index
    %3 = vector.load %arg4[%c0_3, %c0_4] : memref<1x128xf32, #tpu.memory_space<vmem>>, vector<1x128xf32>
    %4 = vector.broadcast %3 : vector<1x128xf32> to vector<32x128xf32>
    %5 = arith.addf %2, %4 : vector<32x128xf32>
    %c0_5 = arith.constant 0 : index
    %c0_6 = arith.constant 0 : index
    %6 = vector.load %arg2[%c0_5, %c0_6] : memref<128x512xbf16, #tpu.memory_space<vmem>>, vector<128x512xbf16>
    %cst_7 = arith.constant dense<0.000000e+00> : vector<32x512xf32>
    %7 = tpu.matmul %0, %6, %cst_7 {dimension_numbers = #tpu.dot_dimension_numbers<[1], [0], [0], [1], [0, 0, 1, 1], [], []>} : vector<32x128xbf16>, vector<128x512xbf16>, vector<32x512xf32> -> vector<32x512xf32>
    %8 = arith.truncf %7 : vector<32x512xf32> to vector<32x512xbf16>
    %9 = vector.extract_strided_slice %8 {offsets = [0, 0], sizes = [32, 128], strides = [1, 1]} : vector<32x512xbf16> to vector<32x128xbf16>
    %c0_8 = arith.constant 0 : index
    %c0_9 = arith.constant 0 : index
    %c0_10 = arith.constant 0 : index
    %10 = vector.load %arg0[%c0_8, %c0_9, %c0_10] : memref<4x32x32xbf16, #tpu.memory_space<vmem>>, vector<1x32x32xbf16>
    %11 = vector.shape_cast %10 : vector<1x32x32xbf16> to vector<32x32xbf16>
    %cst_11 = arith.constant dense<0.000000e+00> : vector<32x128xf32>
    %12 = tpu.matmul %11, %9, %cst_11 {dimension_numbers = #tpu.dot_dimension_numbers<[1], [0], [0], [1], [0, 0, 1, 1], [], []>} : vector<32x32xbf16>, vector<32x128xbf16>, vector<32x128xf32> -> vector<32x128xf32>
    %13 = arith.addf %5, %12 : vector<32x128xf32>
    %14 = vector.extract_strided_slice %8 {offsets = [0, 128], sizes = [32, 128], strides = [1, 1]} : vector<32x512xbf16> to vector<32x128xbf16>
    %c1 = arith.constant 1 : index
    %c0_12 = arith.constant 0 : index
    %c0_13 = arith.constant 0 : index
    %15 = vector.load %arg0[%c1, %c0_12, %c0_13] : memref<4x32x32xbf16, #tpu.memory_space<vmem>>, vector<1x32x32xbf16>
    %16 = vector.shape_cast %15 : vector<1x32x32xbf16> to vector<32x32xbf16>
    %cst_14 = arith.constant dense<0.000000e+00> : vector<32x128xf32>
    %17 = tpu.matmul %16, %14, %cst_14 {dimension_numbers = #tpu.dot_dimension_numbers<[1], [0], [0], [1], [0, 0, 1, 1], [], []>} : vector<32x32xbf16>, vector<32x128xbf16>, vector<32x128xf32> -> vector<32x128xf32>
    %18 = arith.addf %13, %17 : vector<32x128xf32>
    %19 = vector.extract_strided_slice %8 {offsets = [0, 256], sizes = [32, 128], strides = [1, 1]} : vector<32x512xbf16> to vector<32x128xbf16>
    %c2 = arith.constant 2 : index
    %c0_15 = arith.constant 0 : index
    %c0_16 = arith.constant 0 : index
    %20 = vector.load %arg0[%c2, %c0_15, %c0_16] : memref<4x32x32xbf16, #tpu.memory_space<vmem>>, vector<1x32x32xbf16>
    %21 = vector.shape_cast %20 : vector<1x32x32xbf16> to vector<32x32xbf16>
    %cst_17 = arith.constant dense<0.000000e+00> : vector<32x128xf32>
    %22 = tpu.matmul %21, %19, %cst_17 {dimension_numbers = #tpu.dot_dimension_numbers<[1], [0], [0], [1], [0, 0, 1, 1], [], []>} : vector<32x32xbf16>, vector<32x128xbf16>, vector<32x128xf32> -> vector<32x128xf32>
    %23 = arith.addf %18, %22 : vector<32x128xf32>
    %24 = vector.extract_strided_slice %8 {offsets = [0, 384], sizes = [32, 128], strides = [1, 1]} : vector<32x512xbf16> to vector<32x128xbf16>
    %c3 = arith.constant 3 : index
    %c0_18 = arith.constant 0 : index
    %c0_19 = arith.constant 0 : index
    %25 = vector.load %arg0[%c3, %c0_18, %c0_19] : memref<4x32x32xbf16, #tpu.memory_space<vmem>>, vector<1x32x32xbf16>
    %26 = vector.shape_cast %25 : vector<1x32x32xbf16> to vector<32x32xbf16>
    %cst_20 = arith.constant dense<0.000000e+00> : vector<32x128xf32>
    %27 = tpu.matmul %26, %24, %cst_20 {dimension_numbers = #tpu.dot_dimension_numbers<[1], [0], [0], [1], [0, 0, 1, 1], [], []>} : vector<32x32xbf16>, vector<32x128xbf16>, vector<32x128xf32> -> vector<32x128xf32>
    %28 = arith.addf %23, %27 : vector<32x128xf32>
    %c0_21 = arith.constant 0 : index
    %c0_22 = arith.constant 0 : index
    %29 = vector.load %arg5[%c0_21, %c0_22] : memref<1x128xf32, #tpu.memory_space<vmem>>, vector<1x128xf32>
    %c0_23 = arith.constant 0 : index
    %c0_24 = arith.constant 0 : index
    %30 = vector.load %arg6[%c0_23, %c0_24] : memref<1x128xf32, #tpu.memory_space<vmem>>, vector<1x128xf32>
    %cst_25 = arith.constant dense<0.000000e+00> : vector<128xf32>
    %31 = vector.multi_reduction <add>, %28, %cst_25 [0] : vector<32x128xf32> to vector<128xf32>
    %32 = vector.shape_cast %31 : vector<128xf32> to vector<1x128xf32>
    %cst_26 = arith.constant 3.200000e+01 : f32
    %33 = vector.broadcast %cst_26 : f32 to vector<1x128xf32>
    %34 = arith.divf %32, %33 : vector<1x128xf32>
    %35 = vector.broadcast %34 : vector<1x128xf32> to vector<32x128xf32>
    %36 = arith.subf %28, %35 : vector<32x128xf32>
    %37 = arith.mulf %36, %36 : vector<32x128xf32>
    %cst_27 = arith.constant dense<0.000000e+00> : vector<128xf32>
    %38 = vector.multi_reduction <add>, %37, %cst_27 [0] : vector<32x128xf32> to vector<128xf32>
    %39 = vector.shape_cast %38 : vector<128xf32> to vector<1x128xf32>
    %cst_28 = arith.constant 3.200000e+01 : f32
    %40 = vector.broadcast %cst_28 : f32 to vector<1x128xf32>
    %41 = arith.divf %39, %40 : vector<1x128xf32>
    %42 = vector.broadcast %34 : vector<1x128xf32> to vector<32x128xf32>
    %43 = arith.subf %28, %42 : vector<32x128xf32>
    %cst_29 = arith.constant 9.99999974E-6 : f32
    %44 = vector.broadcast %cst_29 : f32 to vector<1x128xf32>
    %45 = arith.addf %41, %44 : vector<1x128xf32>
    %46 = math.rsqrt %45 : vector<1x128xf32>
    %47 = vector.broadcast %46 : vector<1x128xf32> to vector<32x128xf32>
    %48 = arith.mulf %43, %47 : vector<32x128xf32>
    %49 = vector.broadcast %29 : vector<1x128xf32> to vector<32x128xf32>
    %50 = arith.mulf %48, %49 : vector<32x128xf32>
    %51 = vector.broadcast %30 : vector<1x128xf32> to vector<32x128xf32>
    %52 = arith.addf %50, %51 : vector<32x128xf32>
    %cst_30 = arith.constant 0.000000e+00 : f32
    %53 = vector.broadcast %cst_30 : f32 to vector<32x128xf32>
    %54 = arith.maximumf %52, %53 : vector<32x128xf32>
    %c0_31 = arith.constant 0 : index
    %c0_32 = arith.constant 0 : index
    %55 = vector.load %arg7[%c0_31, %c0_32] : memref<32x128xf32, #tpu.memory_space<vmem>>, vector<32x128xf32>
    tpu.vector_store %arg7[%c0_31, %c0_32], %54 {strides = array<i32>} : memref<32x128xf32, #tpu.memory_space<vmem>>, vector<32x128xf32>,
    return
  }
}

module attributes {stable_mosaic.version = 11 : i64} {
  func.func @decode_mlp_kernel(%arg0: memref<16x128xf32, #tpu.memory_space<vmem>>, %arg1: memref<1x128xf32, #tpu.memory_space<vmem>>, %arg2: memref<1x128xf32, #tpu.memory_space<vmem>>, %arg3: memref<128x512xbf16, #tpu.memory_space<vmem>>, %arg4: memref<1x512xf32, #tpu.memory_space<vmem>>, %arg5: memref<1x512xf32, #tpu.memory_space<vmem>>, %arg6: memref<1x512xf32, #tpu.memory_space<vmem>>, %arg7: memref<512x256xbf16, #tpu.memory_space<vmem>>, %arg8: memref<1x256xf32, #tpu.memory_space<vmem>>, %arg9: memref<1x256xf32, #tpu.memory_space<vmem>>, %arg10: memref<1x256xf32, #tpu.memory_space<vmem>>, %arg11: memref<256x128xbf16, #tpu.memory_space<vmem>>, %arg12: memref<1x128xf32, #tpu.memory_space<vmem>>, %arg13: memref<1x128xf32, #tpu.memory_space<vmem>>, %arg14: memref<1x128xf32, #tpu.memory_space<vmem>>, %arg15: memref<128x128xbf16, #tpu.memory_space<vmem>>, %arg16: memref<1x128xf32, #tpu.memory_space<vmem>>, %arg17: memref<1x128xf32, #tpu.memory_space<vmem>>, %arg18: memref<1x128xf32, #tpu.memory_space<vmem>>, %arg19: memref<128x128xbf16, #tpu.memory_space<vmem>>, %arg20: memref<1x128xf32, #tpu.memory_space<vmem>>, %arg21: memref<16x128xf32, #tpu.memory_space<vmem>>) attributes {dimension_semantics = [], scalar_prefetch = 0 : i64, scratch_operands = 0 : i64, tpu.core_type = #tpu.core_type<tc>} {
    %c0 = arith.constant 0 : index
    %c0_0 = arith.constant 0 : index
    %0 = vector.load %arg0[%c0, %c0_0] : memref<16x128xf32, #tpu.memory_space<vmem>>, vector<16x128xf32>
    %c0_1 = arith.constant 0 : index
    %c0_2 = arith.constant 0 : index
    %1 = vector.load %arg1[%c0_1, %c0_2] : memref<1x128xf32, #tpu.memory_space<vmem>>, vector<1x128xf32>
    %c0_3 = arith.constant 0 : index
    %c0_4 = arith.constant 0 : index
    %2 = vector.load %arg2[%c0_3, %c0_4] : memref<1x128xf32, #tpu.memory_space<vmem>>, vector<1x128xf32>
    %cst = arith.constant dense<0.000000e+00> : vector<128xf32>
    %3 = vector.multi_reduction <add>, %0, %cst [0] : vector<16x128xf32> to vector<128xf32>
    %4 = vector.shape_cast %3 : vector<128xf32> to vector<1x128xf32>
    %cst_5 = arith.constant 1.600000e+01 : f32
    %5 = vector.broadcast %cst_5 : f32 to vector<1x128xf32>
    %6 = arith.divf %4, %5 : vector<1x128xf32>
    %7 = vector.broadcast %6 : vector<1x128xf32> to vector<16x128xf32>
    %8 = arith.subf %0, %7 : vector<16x128xf32>
    %9 = arith.mulf %8, %8 : vector<16x128xf32>
    %cst_6 = arith.constant dense<0.000000e+00> : vector<128xf32>
    %10 = vector.multi_reduction <add>, %9, %cst_6 [0] : vector<16x128xf32> to vector<128xf32>
    %11 = vector.shape_cast %10 : vector<128xf32> to vector<1x128xf32>
    %cst_7 = arith.constant 1.600000e+01 : f32
    %12 = vector.broadcast %cst_7 : f32 to vector<1x128xf32>
    %13 = arith.divf %11, %12 : vector<1x128xf32>
    %14 = vector.broadcast %6 : vector<1x128xf32> to vector<16x128xf32>
    %15 = arith.subf %0, %14 : vector<16x128xf32>
    %cst_8 = arith.constant 9.99999974E-6 : f32
    %16 = vector.broadcast %cst_8 : f32 to vector<1x128xf32>
    %17 = arith.addf %13, %16 : vector<1x128xf32>
    %18 = math.rsqrt %17 : vector<1x128xf32>
    %19 = vector.broadcast %18 : vector<1x128xf32> to vector<16x128xf32>
    %20 = arith.mulf %15, %19 : vector<16x128xf32>
    %21 = vector.broadcast %1 : vector<1x128xf32> to vector<16x128xf32>
    %22 = arith.mulf %20, %21 : vector<16x128xf32>
    %23 = vector.broadcast %2 : vector<1x128xf32> to vector<16x128xf32>
    %24 = arith.addf %22, %23 : vector<16x128xf32>
    %cst_9 = arith.constant 0.000000e+00 : f32
    %25 = vector.broadcast %cst_9 : f32 to vector<16x128xf32>
    %26 = arith.maximumf %24, %25 : vector<16x128xf32>
    %27 = arith.truncf %26 : vector<16x128xf32> to vector<16x128xbf16>
    %c0_10 = arith.constant 0 : index
    %c0_11 = arith.constant 0 : index
    %28 = vector.load %arg3[%c0_10, %c0_11] : memref<128x512xbf16, #tpu.memory_space<vmem>>, vector<128x512xbf16>
    %cst_12 = arith.constant dense<0.000000e+00> : vector<16x512xf32>
    %29 = tpu.matmul %27, %28, %cst_12 {dimension_numbers = #tpu.dot_dimension_numbers<[1], [0], [0], [1], [0, 0, 1, 1], [], []>} : vector<16x128xbf16>, vector<128x512xbf16>, vector<16x512xf32> -> vector<16x512xf32>
    %c0_13 = arith.constant 0 : index
    %c0_14 = arith.constant 0 : index
    %30 = vector.load %arg4[%c0_13, %c0_14] : memref<1x512xf32, #tpu.memory_space<vmem>>, vector<1x512xf32>
    %31 = vector.broadcast %30 : vector<1x512xf32> to vector<16x512xf32>
    %32 = arith.addf %29, %31 : vector<16x512xf32>
    %c0_15 = arith.constant 0 : index
    %c0_16 = arith.constant 0 : index
    %33 = vector.load %arg5[%c0_15, %c0_16] : memref<1x512xf32, #tpu.memory_space<vmem>>, vector<1x512xf32>
    %c0_17 = arith.constant 0 : index
    %c0_18 = arith.constant 0 : index
    %34 = vector.load %arg6[%c0_17, %c0_18] : memref<1x512xf32, #tpu.memory_space<vmem>>, vector<1x512xf32>
    %cst_19 = arith.constant dense<0.000000e+00> : vector<512xf32>
    %35 = vector.multi_reduction <add>, %32, %cst_19 [0] : vector<16x512xf32> to vector<512xf32>
    %36 = vector.shape_cast %35 : vector<512xf32> to vector<1x512xf32>
    %cst_20 = arith.constant 1.600000e+01 : f32
    %37 = vector.broadcast %cst_20 : f32 to vector<1x512xf32>
    %38 = arith.divf %36, %37 : vector<1x512xf32>
    %39 = vector.broadcast %38 : vector<1x512xf32> to vector<16x512xf32>
    %40 = arith.subf %32, %39 : vector<16x512xf32>
    %41 = arith.mulf %40, %40 : vector<16x512xf32>
    %cst_21 = arith.constant dense<0.000000e+00> : vector<512xf32>
    %42 = vector.multi_reduction <add>, %41, %cst_21 [0] : vector<16x512xf32> to vector<512xf32>
    %43 = vector.shape_cast %42 : vector<512xf32> to vector<1x512xf32>
    %cst_22 = arith.constant 1.600000e+01 : f32
    %44 = vector.broadcast %cst_22 : f32 to vector<1x512xf32>
    %45 = arith.divf %43, %44 : vector<1x512xf32>
    %46 = vector.broadcast %38 : vector<1x512xf32> to vector<16x512xf32>
    %47 = arith.subf %32, %46 : vector<16x512xf32>
    %cst_23 = arith.constant 9.99999974E-6 : f32
    %48 = vector.broadcast %cst_23 : f32 to vector<1x512xf32>
    %49 = arith.addf %45, %48 : vector<1x512xf32>
    %50 = math.rsqrt %49 : vector<1x512xf32>
    %51 = vector.broadcast %50 : vector<1x512xf32> to vector<16x512xf32>
    %52 = arith.mulf %47, %51 : vector<16x512xf32>
    %53 = vector.broadcast %33 : vector<1x512xf32> to vector<16x512xf32>
    %54 = arith.mulf %52, %53 : vector<16x512xf32>
    %55 = vector.broadcast %34 : vector<1x512xf32> to vector<16x512xf32>
    %56 = arith.addf %54, %55 : vector<16x512xf32>
    %cst_24 = arith.constant 0.000000e+00 : f32
    %57 = vector.broadcast %cst_24 : f32 to vector<16x512xf32>
    %58 = arith.maximumf %56, %57 : vector<16x512xf32>
    %59 = arith.truncf %58 : vector<16x512xf32> to vector<16x512xbf16>
    %c0_25 = arith.constant 0 : index
    %c0_26 = arith.constant 0 : index
    %60 = vector.load %arg7[%c0_25, %c0_26] : memref<512x256xbf16, #tpu.memory_space<vmem>>, vector<512x256xbf16>
    %cst_27 = arith.constant dense<0.000000e+00> : vector<16x256xf32>
    %61 = tpu.matmul %59, %60, %cst_27 {dimension_numbers = #tpu.dot_dimension_numbers<[1], [0], [0], [1], [0, 0, 1, 1], [], []>} : vector<16x512xbf16>, vector<512x256xbf16>, vector<16x256xf32> -> vector<16x256xf32>
    %c0_28 = arith.constant 0 : index
    %c0_29 = arith.constant 0 : index
    %62 = vector.load %arg8[%c0_28, %c0_29] : memref<1x256xf32, #tpu.memory_space<vmem>>, vector<1x256xf32>
    %63 = vector.broadcast %62 : vector<1x256xf32> to vector<16x256xf32>
    %64 = arith.addf %61, %63 : vector<16x256xf32>
    %c0_30 = arith.constant 0 : index
    %c0_31 = arith.constant 0 : index
    %65 = vector.load %arg9[%c0_30, %c0_31] : memref<1x256xf32, #tpu.memory_space<vmem>>, vector<1x256xf32>
    %c0_32 = arith.constant 0 : index
    %c0_33 = arith.constant 0 : index
    %66 = vector.load %arg10[%c0_32, %c0_33] : memref<1x256xf32, #tpu.memory_space<vmem>>, vector<1x256xf32>
    %cst_34 = arith.constant dense<0.000000e+00> : vector<256xf32>
    %67 = vector.multi_reduction <add>, %64, %cst_34 [0] : vector<16x256xf32> to vector<256xf32>
    %68 = vector.shape_cast %67 : vector<256xf32> to vector<1x256xf32>
    %cst_35 = arith.constant 1.600000e+01 : f32
    %69 = vector.broadcast %cst_35 : f32 to vector<1x256xf32>
    %70 = arith.divf %68, %69 : vector<1x256xf32>
    %71 = vector.broadcast %70 : vector<1x256xf32> to vector<16x256xf32>
    %72 = arith.subf %64, %71 : vector<16x256xf32>
    %73 = arith.mulf %72, %72 : vector<16x256xf32>
    %cst_36 = arith.constant dense<0.000000e+00> : vector<256xf32>
    %74 = vector.multi_reduction <add>, %73, %cst_36 [0] : vector<16x256xf32> to vector<256xf32>
    %75 = vector.shape_cast %74 : vector<256xf32> to vector<1x256xf32>
    %cst_37 = arith.constant 1.600000e+01 : f32
    %76 = vector.broadcast %cst_37 : f32 to vector<1x256xf32>
    %77 = arith.divf %75, %76 : vector<1x256xf32>
    %78 = vector.broadcast %70 : vector<1x256xf32> to vector<16x256xf32>
    %79 = arith.subf %64, %78 : vector<16x256xf32>
    %cst_38 = arith.constant 9.99999974E-6 : f32
    %80 = vector.broadcast %cst_38 : f32 to vector<1x256xf32>
    %81 = arith.addf %77, %80 : vector<1x256xf32>
    %82 = math.rsqrt %81 : vector<1x256xf32>
    %83 = vector.broadcast %82 : vector<1x256xf32> to vector<16x256xf32>
    %84 = arith.mulf %79, %83 : vector<16x256xf32>
    %85 = vector.broadcast %65 : vector<1x256xf32> to vector<16x256xf32>
    %86 = arith.mulf %84, %85 : vector<16x256xf32>
    %87 = vector.broadcast %66 : vector<1x256xf32> to vector<16x256xf32>
    %88 = arith.addf %86, %87 : vector<16x256xf32>
    %cst_39 = arith.constant 0.000000e+00 : f32
    %89 = vector.broadcast %cst_39 : f32 to vector<16x256xf32>
    %90 = arith.maximumf %88, %89 : vector<16x256xf32>
    %91 = arith.truncf %90 : vector<16x256xf32> to vector<16x256xbf16>
    %c0_40 = arith.constant 0 : index
    %c0_41 = arith.constant 0 : index
    %92 = vector.load %arg11[%c0_40, %c0_41] : memref<256x128xbf16, #tpu.memory_space<vmem>>, vector<256x128xbf16>
    %cst_42 = arith.constant dense<0.000000e+00> : vector<16x128xf32>
    %93 = tpu.matmul %91, %92, %cst_42 {dimension_numbers = #tpu.dot_dimension_numbers<[1], [0], [0], [1], [0, 0, 1, 1], [], []>} : vector<16x256xbf16>, vector<256x128xbf16>, vector<16x128xf32> -> vector<16x128xf32>
    %c0_43 = arith.constant 0 : index
    %c0_44 = arith.constant 0 : index
    %94 = vector.load %arg12[%c0_43, %c0_44] : memref<1x128xf32, #tpu.memory_space<vmem>>, vector<1x128xf32>
    %95 = vector.broadcast %94 : vector<1x128xf32> to vector<16x128xf32>
    %96 = arith.addf %93, %95 : vector<16x128xf32>
    %c0_45 = arith.constant 0 : index
    %c0_46 = arith.constant 0 : index
    %97 = vector.load %arg13[%c0_45, %c0_46] : memref<1x128xf32, #tpu.memory_space<vmem>>, vector<1x128xf32>
    %c0_47 = arith.constant 0 : index
    %c0_48 = arith.constant 0 : index
    %98 = vector.load %arg14[%c0_47, %c0_48] : memref<1x128xf32, #tpu.memory_space<vmem>>, vector<1x128xf32>
    %cst_49 = arith.constant dense<0.000000e+00> : vector<128xf32>
    %99 = vector.multi_reduction <add>, %96, %cst_49 [0] : vector<16x128xf32> to vector<128xf32>
    %100 = vector.shape_cast %99 : vector<128xf32> to vector<1x128xf32>
    %cst_50 = arith.constant 1.600000e+01 : f32
    %101 = vector.broadcast %cst_50 : f32 to vector<1x128xf32>
    %102 = arith.divf %100, %101 : vector<1x128xf32>
    %103 = vector.broadcast %102 : vector<1x128xf32> to vector<16x128xf32>
    %104 = arith.subf %96, %103 : vector<16x128xf32>
    %105 = arith.mulf %104, %104 : vector<16x128xf32>
    %cst_51 = arith.constant dense<0.000000e+00> : vector<128xf32>
    %106 = vector.multi_reduction <add>, %105, %cst_51 [0] : vector<16x128xf32> to vector<128xf32>
    %107 = vector.shape_cast %106 : vector<128xf32> to vector<1x128xf32>
    %cst_52 = arith.constant 1.600000e+01 : f32
    %108 = vector.broadcast %cst_52 : f32 to vector<1x128xf32>
    %109 = arith.divf %107, %108 : vector<1x128xf32>
    %110 = vector.broadcast %102 : vector<1x128xf32> to vector<16x128xf32>
    %111 = arith.subf %96, %110 : vector<16x128xf32>
    %cst_53 = arith.constant 9.99999974E-6 : f32
    %112 = vector.broadcast %cst_53 : f32 to vector<1x128xf32>
    %113 = arith.addf %109, %112 : vector<1x128xf32>
    %114 = math.rsqrt %113 : vector<1x128xf32>
    %115 = vector.broadcast %114 : vector<1x128xf32> to vector<16x128xf32>
    %116 = arith.mulf %111, %115 : vector<16x128xf32>
    %117 = vector.broadcast %97 : vector<1x128xf32> to vector<16x128xf32>
    %118 = arith.mulf %116, %117 : vector<16x128xf32>
    %119 = vector.broadcast %98 : vector<1x128xf32> to vector<16x128xf32>
    %120 = arith.addf %118, %119 : vector<16x128xf32>
    %cst_54 = arith.constant 0.000000e+00 : f32
    %121 = vector.broadcast %cst_54 : f32 to vector<16x128xf32>
    %122 = arith.maximumf %120, %121 : vector<16x128xf32>
    %123 = arith.truncf %122 : vector<16x128xf32> to vector<16x128xbf16>
    %c0_55 = arith.constant 0 : index
    %c0_56 = arith.constant 0 : index
    %124 = vector.load %arg15[%c0_55, %c0_56] : memref<128x128xbf16, #tpu.memory_space<vmem>>, vector<128x128xbf16>
    %cst_57 = arith.constant dense<0.000000e+00> : vector<16x128xf32>
    %125 = tpu.matmul %123, %124, %cst_57 {dimension_numbers = #tpu.dot_dimension_numbers<[1], [0], [0], [1], [0, 0, 1, 1], [], []>} : vector<16x128xbf16>, vector<128x128xbf16>, vector<16x128xf32> -> vector<16x128xf32>
    %c0_58 = arith.constant 0 : index
    %c0_59 = arith.constant 0 : index
    %126 = vector.load %arg16[%c0_58, %c0_59] : memref<1x128xf32, #tpu.memory_space<vmem>>, vector<1x128xf32>
    %127 = vector.broadcast %126 : vector<1x128xf32> to vector<16x128xf32>
    %128 = arith.addf %125, %127 : vector<16x128xf32>
    %c0_60 = arith.constant 0 : index
    %c0_61 = arith.constant 0 : index
    %129 = vector.load %arg17[%c0_60, %c0_61] : memref<1x128xf32, #tpu.memory_space<vmem>>, vector<1x128xf32>
    %c0_62 = arith.constant 0 : index
    %c0_63 = arith.constant 0 : index
    %130 = vector.load %arg18[%c0_62, %c0_63] : memref<1x128xf32, #tpu.memory_space<vmem>>, vector<1x128xf32>
    %cst_64 = arith.constant dense<0.000000e+00> : vector<128xf32>
    %131 = vector.multi_reduction <add>, %128, %cst_64 [0] : vector<16x128xf32> to vector<128xf32>
    %132 = vector.shape_cast %131 : vector<128xf32> to vector<1x128xf32>
    %cst_65 = arith.constant 1.600000e+01 : f32
    %133 = vector.broadcast %cst_65 : f32 to vector<1x128xf32>
    %134 = arith.divf %132, %133 : vector<1x128xf32>
    %135 = vector.broadcast %134 : vector<1x128xf32> to vector<16x128xf32>
    %136 = arith.subf %128, %135 : vector<16x128xf32>
    %137 = arith.mulf %136, %136 : vector<16x128xf32>
    %cst_66 = arith.constant dense<0.000000e+00> : vector<128xf32>
    %138 = vector.multi_reduction <add>, %137, %cst_66 [0] : vector<16x128xf32> to vector<128xf32>
    %139 = vector.shape_cast %138 : vector<128xf32> to vector<1x128xf32>
    %cst_67 = arith.constant 1.600000e+01 : f32
    %140 = vector.broadcast %cst_67 : f32 to vector<1x128xf32>
    %141 = arith.divf %139, %140 : vector<1x128xf32>
    %142 = vector.broadcast %134 : vector<1x128xf32> to vector<16x128xf32>
    %143 = arith.subf %128, %142 : vector<16x128xf32>
    %cst_68 = arith.constant 9.99999974E-6 : f32
    %144 = vector.broadcast %cst_68 : f32 to vector<1x128xf32>
    %145 = arith.addf %141, %144 : vector<1x128xf32>
    %146 = math.rsqrt %145 : vector<1x128xf32>
    %147 = vector.broadcast %146 : vector<1x128xf32> to vector<16x128xf32>
    %148 = arith.mulf %143, %147 : vector<16x128xf32>
    %149 = vector.broadcast %129 : vector<1x128xf32> to vector<16x128xf32>
    %150 = arith.mulf %148, %149 : vector<16x128xf32>
    %151 = vector.broadcast %130 : vector<1x128xf32> to vector<16x128xf32>
    %152 = arith.addf %150, %151 : vector<16x128xf32>
    %cst_69 = arith.constant 0.000000e+00 : f32
    %153 = vector.broadcast %cst_69 : f32 to vector<16x128xf32>
    %154 = arith.maximumf %152, %153 : vector<16x128xf32>
    %155 = arith.truncf %154 : vector<16x128xf32> to vector<16x128xbf16>
    %c0_70 = arith.constant 0 : index
    %c0_71 = arith.constant 0 : index
    %156 = vector.load %arg19[%c0_70, %c0_71] : memref<128x128xbf16, #tpu.memory_space<vmem>>, vector<128x128xbf16>
    %cst_72 = arith.constant dense<0.000000e+00> : vector<16x128xf32>
    %157 = tpu.matmul %155, %156, %cst_72 {dimension_numbers = #tpu.dot_dimension_numbers<[1], [0], [0], [1], [0, 0, 1, 1], [], []>} : vector<16x128xbf16>, vector<128x128xbf16>, vector<16x128xf32> -> vector<16x128xf32>
    %c0_73 = arith.constant 0 : index
    %c0_74 = arith.constant 0 : index
    %158 = vector.load %arg20[%c0_73, %c0_74] : memref<1x128xf32, #tpu.memory_space<vmem>>, vector<1x128xf32>
    %159 = vector.broadcast %158 : vector<1x128xf32> to vector<16x128xf32>
    %160 = arith.addf %157, %159 : vector<16x128xf32>
    %c0_75 = arith.constant 0 : index
    %c0_76 = arith.constant 0 : index
    %161 = vector.load %arg21[%c0_75, %c0_76] : memref<16x128xf32, #tpu.memory_space<vmem>>, vector<16x128xf32>
    tpu.vector_store %arg21[%c0_75, %c0_76], %160 {strides = array<i32>} : memref<16x128xf32, #tpu.memory_space<vmem>>, vector<16x128xf32>,
    return
  }
}

</mosaic_0001>

<bundles_post_ra>
// kernel: _lambda_.3
= control target key start
LH: loop header
LB: loop body
LE: loop exit
PB: predicated region body
PF: predicated region fallthrough
CT: control target
= control target key end

     0   :  { %vm53_vm0 = vcmask 130048   ;;  %vm213_vm1 = vcmask 261120   ;;  %s744_s3 = inlined_call_operand.vmem [shape: bf16[16,128], index: 3, kind: input, shape index: {}]   ;;  %s745_s2 = inlined_call_operand.vmem [shape: bf16[16,512], index: 2, kind: input, shape index: {}]   ;;  %s746_s1 = inlined_call_operand.vmem [shape: bf16[32,16], index: 1, kind: input, shape index: {}]   ;;  %s747_s4 = inlined_call_operand.vmem [shape: f32[1,128], index: 4, kind: input, shape index: {}]   ;;  %s748_s0 = inlined_call_operand.vmem [shape: bf16[4,32,32], index: 0, kind: input, shape index: {}]   ;;  %s749_s5 = inlined_call_operand.vmem [shape: f32[1,128], index: 5, kind: input, shape index: {}]   ;;  %s750_s6 = inlined_call_operand.vmem [shape: f32[1,128], index: 6, kind: input, shape index: {}]   ;;  %s751_s7 = inlined_call_operand.vmem [shape: f32[32,128], index: 7, kind: output, shape index: {}]  }
   0x1   :  { %v573_v0 = vld [vmem:[%s744_s3] sm:$0xff]  ;;  %v499_v2 = vld [vmem:[%s745_s2 + $0x10] sm:$0xf0]  ;;  %v572_v5 = vld [vmem:[%s746_s1 + $0x8] sm:$0xff] }
   0x2   :  { %v574_v1 = vld [vmem:[%s745_s2 + $0x4] sm:$0xf]  ;;  %v505_v6 = vld [vmem:[%s745_s2 + $0x8] sm:$0xf]  ;;  %67 = vmatpush.bf16.msra.mxu0 %v573_v0  ;;  %586 = vmatpush.bf16.msra.mxu1 %v573_v0  ;;  %v577_v7 = vld [vmem:[%s745_s2 + $0x14] sm:$0xf0] }
   0x3   :  { %v502_v3 = vor.u32 %v574_v1, %v499_v2  ;;  %v571_v4 = vld [vmem:[%s746_s1] sm:$0xff]  ;;  %v576_v9 = vld [vmem:[%s745_s2 + $0xc] sm:$0xf0]  ;;  %v506_v10 = vor.u32 %v577_v7, %v505_v6  ;;  %v575_v12 = vld [vmem:[%s745_s2 + $0xc] sm:$0xf] }
   0x4   :  { %v497_v8 = vld [vmem:[%s745_s2] sm:$0xf]  ;;  %v507_v13 = vld [vmem:[%s745_s2 + $0x18] sm:$0xf0] }
   0x5   :  { %129 = vmatpush.bf16.msra.mxu2 %v502_v3  ;;  %v498_v11 = vor.u32 %v576_v9, %v497_v8  ;;  %v510_v14 = vor.u32 %v575_v12, %v507_v13  ;;  %493 = vmatmul.msk.bf16.vlgmr.msra.gmra.mxu0 %vm53_vm0, %v571_v4  ;;  %v588_v15 = vld [vmem:[%s747_s4] ss:$0 sm:$0xff]  ;;  %v580_v9 = vld [vmem:[%s748_s0 + $0x10] sm:$0xff]  ;;  %v579_v12 = vld [vmem:[%s748_s0 + $0x8] sm:$0xff] }
   0x6   :  { %494 = vmatmul.msk.bf16.vlgmr.msra.gmra.mxu1 %vm53_vm0, %v572_v5  ;;  %148 = vmatpush.bf16.msra.mxu3 %v506_v10  ;;  %v578_v8 = vld [vmem:[%s748_s0] sm:$0xff]  ;;  %v581_v13 = vld [vmem:[%s748_s0 + $0x18] sm:$0xff] }
   0x7   :  { %110 = vmatpush.bf16.msrb.mxu1 %v498_v11  ;;  %167 = vmatpush.bf16.msrb.mxu0 %v510_v14  ;;  %v582_v10 = vld [vmem:[%s748_s0 + $0x20] sm:$0xff]  ;;  %v584_v11 = vld [vmem:[%s748_s0 + $0x30] sm:$0xff]  ;;  %v583_v14 = vld [vmem:[%s748_s0 + $0x28] sm:$0xff] }
   0x8   :  { %513 = vmatmul.msk.bf16.vlgmr.msra.gmra.mxu2 %vm53_vm0, %v571_v4 }
   0x9   :  { %515 = vmatmul.msk.bf16.vlgmr.msra.gmra.mxu3 %vm53_vm0, %v571_v4 }
  0x15   :  { %517 = vmatmul.msk.bf16.vlgmr.msrb.gmra.mxu0 %vm53_vm0, %v571_v4 }
  0x16   :  { %511 = vmatmul.msk.bf16.vlgmr.msrb.gmra.mxu1 %vm53_vm0, %v571_v4 }
  0x18   :  { %514 = vmatmul.msk.bf16.gmra.mxu2 %vm53_vm0, %v572_v5 }
  0x19   :  { %516 = vmatmul.msk.bf16.gmra.mxu3 %vm53_vm0, %v572_v5 }
  0x25   :  { %518 = vmatmul.msk.bf16.gmra.mxu0 %vm53_vm0, %v572_v5 }
  0x26   :  { %512 = vmatmul.msk.bf16.gmra.mxu1 %vm53_vm0, %v572_v5 }
  0x82   :  { %v69_v16 = vpop.f32.mrf.mxu0 }
  0x83   :  { %v74_v17 = vpop.f32.mrf.mxu1  ;;  %v682_v18 = vadd.f32 %v588_v15, %v69_v16 }
  0x84   :  { %v684_v19 = vadd.f32 %v588_v15, %v74_v17 }
  0x8a   :  { %v71_v20 = vpop.f32.mrf.mxu0 }
  0x8b   :  { %v76_v21 = vpop.f32.mrf.mxu1  ;;  %v686_v22 = vadd.f32 %v588_v15, %v71_v20  ;;  %v131_v24 = vpop.f32.mrf.mxu2 }
  0x8c   :  { %v688_v23 = vadd.f32 %v588_v15, %v76_v21  ;;  %v150_v25 = vpop.f32.mrf.mxu3  ;;  %v585_v15 = vld [vmem:[%s748_s0 + $0x38] sm:$0xff] }
  0x92   :  { %v169_v27 = vpop.f32.mrf.mxu0 }
  0x93   :  { %v112_v26 = vpop.f32.mrf.mxu1  ;;  %v133_v28 = vpop.f32.mrf.mxu2  ;;  %v180_v55 = vpack.c.bf16 %v169_v27, %v150_v25 }
  0x94   :  { %v152_v29 = vpop.f32.mrf.mxu3  ;;  %v179_v43 = vpack.c.bf16 %v131_v24, %v112_v26 }
  0x95   :  { %v314_v2 = vunpack.c.l.b16 %v180_v55  ;;  %v366_v3 = vunpack.c.h.b16 %v180_v55 }
  0x96   :  { %v205_v0 = vunpack.c.l.b16 %v179_v43  ;;  %v258_v1 = vunpack.c.h.b16 %v179_v43 }
  0x9a   :  { %v171_v31 = vpop.f32.mrf.mxu0 }
  0x9b   :  { %v114_v30 = vpop.f32.mrf.mxu1  ;;  %v136_v32 = vpop.f32.mrf.mxu2  ;;  %v182_v44 = vpack.c.bf16 %v171_v31, %v152_v29 }
  0x9c   :  { %v155_v33 = vpop.f32.mrf.mxu3  ;;  %v181_v40 = vpack.c.bf16 %v133_v28, %v114_v30 }
  0x9d   :  { %v315_v62 = vunpack.c.l.b16 %v182_v44  ;;  %v367_v63 = vunpack.c.h.b16 %v182_v44 }
  0x9e   :  { %v206_v56 = vunpack.c.l.b16 %v181_v40  ;;  %v259_v57 = vunpack.c.h.b16 %v181_v40 }
  0x9f   :  { %v318_v6 = vpack.c.b16 %v315_v62, %v314_v2  ;;  %v370_v7 = vpack.c.b16 %v367_v63, %v366_v3 }
  0xa0   :  { %v209_v4 = vpack.c.b16 %v206_v56, %v205_v0  ;;  %v262_v5 = vpack.c.b16 %v259_v57, %v258_v1 }
  0xa2   :  { %v174_v35 = vpop.f32.mrf.mxu0 }
  0xa3   :  { %v117_v34 = vpop.f32.mrf.mxu1  ;;  %v184_v37 = vpack.c.bf16 %v174_v35, %v155_v33  ;;  %v138_v38 = vpop.f32.mrf.mxu2 }
  0xa4   :  { %v183_v36 = vpack.c.bf16 %v136_v32, %v117_v34  ;;  %v157_v39 = vpop.f32.mrf.mxu3 }
  0xa5   :  { %v316_v49 = vunpack.c.l.b16 %v184_v37  ;;  %v368_v50 = vunpack.c.h.b16 %v184_v37 }
  0xa6   :  { %v207_v47 = vunpack.c.l.b16 %v183_v36  ;;  %v260_v48 = vunpack.c.h.b16 %v183_v36 }
  0xaa   :  { %v176_v42 = vpop.f32.mrf.mxu0 }
  0xab   :  { %v119_v41 = vpop.f32.mrf.mxu1  ;;  %v186_v46 = vpack.c.bf16 %v176_v42, %v157_v39  ;;  %v595_v42 = vmov 32.0  }
  0xac   :  { %v185_v45 = vpack.c.bf16 %v138_v38, %v119_v41  ;;  %591 = vrcp.f32 %v595_v42 }
  0xad   :  { %v317_v53 = vunpack.c.l.b16 %v186_v46  ;;  %v369_v54 = vunpack.c.h.b16 %v186_v46 }
  0xae   :  { %v208_v51 = vunpack.c.l.b16 %v185_v45  ;;  %v261_v52 = vunpack.c.h.b16 %v185_v45 }
  0xaf   :  { %v371_v59 = vpack.c.b16 %v369_v54, %v368_v50  ;;  %v319_v61 = vpack.c.b16 %v317_v53, %v316_v49 }
  0xb0   :  { %v210_v58 = vpack.c.b16 %v208_v51, %v207_v47  ;;  %v263_v60 = vpack.c.b16 %v261_v52, %v260_v48 }
  0xb1   :  { %334 = vmatpush.bf16.msrb.mxu3 %v319_v61  ;;  %386 = vmatpush.bf16.msra.mxu0 %v371_v59 }
  0xb2   :  { %226 = vmatpush.bf16.msra.mxu1 %v210_v58  ;;  %278 = vmatpush.bf16.msrb.mxu2 %v263_v60  ;;  %v592_v45 = vpop.eup %591 }
  0xb3   :  { %v415_v51 = vmul.f32 32.0, %v592_v45  ;;  %vm419_vm2 = vweird.f32 %v592_v45 }
  0xb5   :  { %335 = vmatpush.bf16.msrb.mxu3 %v318_v6  ;;  %387 = vmatpush.bf16.msra.mxu0 %v370_v7  ;;  %v416_v54 = vsub.f32 1.0, %v415_v51 }
  0xb6   :  { %227 = vmatpush.bf16.msra.mxu1 %v209_v4  ;;  %279 = vmatpush.bf16.msrb.mxu2 %v262_v5 }
  0xb7   :  { %v417_v57 = vmul.f32 %v592_v45, %v416_v54 }
  0xb8   :  { %555 = vmatmul.msk.bf16.vlgmr.msrb.gmra.mxu3 %vm213_vm1, %v582_v10  ;;  %569 = vmatmul.msk.bf16.vlgmr.msra.gmra.mxu0 %vm213_vm1, %v584_v11 }
  0xb9   :  { %527 = vmatmul.msk.bf16.vlgmr.msra.gmra.mxu1 %vm213_vm1, %v578_v8  ;;  %541 = vmatmul.msk.bf16.vlgmr.msrb.gmra.mxu2 %vm213_vm1, %v580_v9  ;;  %v418_v60 = vadd.f32 %v592_v45, %v417_v57 }
  0xbb   :  { %v420_v63 = vsel %vm419_vm2, %v592_v45, %v418_v60 }
  0xc8   :  { %556 = vmatmul.msk.bf16.gmra.mxu3 %vm213_vm1, %v583_v14  ;;  %570 = vmatmul.msk.bf16.gmra.mxu0 %vm213_vm1, %v585_v15 }
  0xc9   :  { %528 = vmatmul.msk.bf16.gmra.mxu1 %vm213_vm1, %v579_v12  ;;  %542 = vmatmul.msk.bf16.gmra.mxu2 %vm213_vm1, %v581_v13 }
 0x135   :  { %v389_v17 = vpop.f32.mrf.mxu0 }
 0x136   :  { %v229_v16 = vpop.f32.mrf.mxu1 }
 0x137   :  { %v239_v25 = vadd.f32 %v229_v16, %v682_v18 }
 0x13b   :  { %v337_v21 = vpop.f32.mrf.mxu3 }
 0x13c   :  { %v281_v20 = vpop.f32.mrf.mxu2 }
 0x13d   :  { %v291_v26 = vadd.f32 %v281_v20, %v239_v25  ;;  %v391_v29 = vpop.f32.mrf.mxu0 }
 0x13e   :  { %v231_v24 = vpop.f32.mrf.mxu1 }
 0x13f   :  { %v240_v27 = vadd.f32 %v231_v24, %v686_v22  ;;  %v347_v30 = vadd.f32 %v337_v21, %v291_v26 }
 0x141   :  { %v399_v35 = vadd.f32 %v389_v17, %v347_v30  ;;  %v589_v30 = vld [vmem:[%s749_s5] ss:$0 sm:$0xff] }
 0x143   :  { %v339_v32 = vpop.f32.mrf.mxu3 }
 0x144   :  { %v283_v28 = vpop.f32.mrf.mxu2 }
 0x145   :  { %v292_v31 = vadd.f32 %v283_v28, %v240_v27  ;;  %v394_v18 = vpop.f32.mrf.mxu0 }
 0x146   :  { %v234_v33 = vpop.f32.mrf.mxu1 }
 0x147   :  { %v348_v34 = vadd.f32 %v339_v32, %v292_v31  ;;  %v241_v37 = vadd.f32 %v234_v33, %v684_v19 }
 0x149   :  { %v400_v36 = vadd.f32 %v391_v29, %v348_v34 }
 0x14b   :  { %v405_v38 = vadd.f32 %v400_v36, %v399_v35  ;;  %v342_v41 = vpop.f32.mrf.mxu3 }
 0x14c   :  { %v286_v39 = vpop.f32.mrf.mxu2 }
 0x14d   :  { %v293_v40 = vadd.f32 %v286_v39, %v241_v37  ;;  %v396_v19 = vpop.f32.mrf.mxu0 }
 0x14e   :  { %v236_v22 = vpop.f32.mrf.mxu1 }
 0x14f   :  { %v349_v43 = vadd.f32 %v342_v41, %v293_v40  ;;  %v242_v46 = vadd.f32 %v236_v22, %v688_v23 }
 0x151   :  { %v401_v44 = vadd.f32 %v394_v18, %v349_v43 }
 0x153   :  { %v406_v47 = vadd.f32 %v405_v38, %v401_v44  ;;  %v344_v50 = vpop.f32.mrf.mxu3 }
 0x154   :  { %v288_v48 = vpop.f32.mrf.mxu2 }
 0x155   :  { %v294_v49 = vadd.f32 %v288_v48, %v242_v46 }
 0x157   :  { %v350_v52 = vadd.f32 %v344_v50, %v294_v49 }
 0x159   :  { %v402_v53 = vadd.f32 %v396_v19, %v350_v52 }
 0x15b   :  { %v407_v55 = vadd.f32 %v406_v47, %v402_v53 }
 0x15d   :  { %v408_v56 = vrot.slane %v407_v55, 4 }
 0x15f   :  { %v409_v58 = vadd.f32 %v408_v56, %v407_v55 }
 0x161   :  { %v410_v59 = vrot.slane %v409_v58, 2 }
 0x163   :  { %v411_v61 = vadd.f32 %v410_v59, %v409_v58 }
 0x165   :  { %v412_v62 = vrot.slane %v411_v61, 1 }
 0x167   :  { %v413_v23 = vadd.f32 %v412_v62, %v411_v61 }
 0x169   :  { %v421_v0 = vmul.f32 %v420_v63, %v413_v23 }
 0x16b   :  { %v422_v1 = vsub.f32 %v399_v35, %v421_v0  ;;  %v423_v2 = vsub.f32 %v400_v36, %v421_v0  ;;  %v424_v3 = vsub.f32 %v401_v44, %v421_v0  ;;  %v425_v4 = vsub.f32 %v402_v53, %v421_v0  ;;  %v590_v36 = vld [vmem:[%s750_s6] ss:$0 sm:$0xff] }
 0x16d   :  { %v426_v5 = vmul.f32 %v422_v1, %v422_v1  ;;  %v427_v6 = vmul.f32 %v423_v2, %v423_v2  ;;  %v428_v7 = vmul.f32 %v424_v3, %v424_v3  ;;  %v429_v9 = vmul.f32 %v425_v4, %v425_v4 }
 0x16f   :  { %v430_v8 = vadd.f32 %v427_v6, %v426_v5 }
 0x171   :  { %v431_v10 = vadd.f32 %v430_v8, %v428_v7 }
 0x173   :  { %v432_v11 = vadd.f32 %v431_v10, %v429_v9 }
 0x175   :  { %v433_v12 = vrot.slane %v432_v11, 4 }
 0x177   :  { %v434_v13 = vadd.f32 %v433_v12, %v432_v11 }
 0x179   :  { %v435_v14 = vrot.slane %v434_v13, 2 }
 0x17b   :  { %v436_v15 = vadd.f32 %v435_v14, %v434_v13 }
 0x17d   :  { %v437_v16 = vrot.slane %v436_v15, 1 }
 0x17f   :  { %v438_v17 = vadd.f32 %v437_v16, %v436_v15 }
 0x181   :  { %v439_v20 = vmul.f32 %v438_v17, %v420_v63 }
 0x183   :  { %v440_v21 = vadd.f32 1e-05, %v439_v20 }
 0x185   :  { %593 = vrsqrt.f32 %v440_v21  ;;  %vm447_vm4 = vweird.f32 %v440_v21 }
 0x18b   :  { %v594_v24 = vpop.eup %593 }
 0x18c   :  { %v442_v25 = vmul.f32 %v594_v24, %v440_v21  ;;  %vm448_vm3 = vweird.f32 %v594_v24 }
 0x18d   :  { %vm449_vm5 = vmor %vm447_vm4, %vm448_vm3 }
 0x18e   :  { %v443_v26 = vmul.f32 %v594_v24, %v442_v25 }
 0x190   :  { %v444_v27 = vmul.f32 0.5, %v443_v26 }
 0x192   :  { %v445_v28 = vsub.f32 1.5, %v444_v27 }
 0x194   :  { %v446_v29 = vmul.f32 %v594_v24, %v445_v28 }
 0x196   :  { %v450_v31 = vsel %vm449_vm5, %v594_v24, %v446_v29 }
 0x197   :  { %v451_v32 = vmul.f32 %v450_v31, %v422_v1  ;;  %v452_v33 = vmul.f32 %v450_v31, %v423_v2  ;;  %v453_v34 = vmul.f32 %v450_v31, %v424_v3  ;;  %v454_v35 = vmul.f32 %v450_v31, %v425_v4 }
 0x199   :  { %v458_v37 = vmul.f32 %v589_v30, %v451_v32  ;;  %v459_v38 = vmul.f32 %v589_v30, %v452_v33  ;;  %v460_v39 = vmul.f32 %v589_v30, %v453_v34  ;;  %v461_v40 = vmul.f32 %v589_v30, %v454_v35 }
 0x19b   :  { %v465_v41 = vadd.f32 %v590_v36, %v458_v37  ;;  %v466_v42 = vadd.f32 %v590_v36, %v459_v38  ;;  %v467_v18 = vadd.f32 %v590_v36, %v460_v39  ;;  %v468_v43 = vadd.f32 %v590_v36, %v461_v40 }
 0x19d   :  { %v469_v22 = vmax.f32 %v465_v41, 0.0  ;;  %v470_v44 = vmax.f32 %v466_v42, 0.0  ;;  %v471_v45 = vmax.f32 %v467_v18, 0.0  ;;  %v472_v46 = vmax.f32 %v468_v43, 0.0 }
 0x19f   :  { %473 = vst [vmem:[%s751_s7] sm:$0xff] %v469_v22 }
 0x1a0   :  { %474 = vst [vmem:[%s751_s7 + $0x8] sm:$0xff] %v470_v44 }
 0x1a1   :  { %475 = vst [vmem:[%s751_s7 + $0x10] sm:$0xff] %v471_v45 }
 0x1a2   :  { %476 = vst [vmem:[%s751_s7 + $0x18] sm:$0xff] %v472_v46 }

// kernel: _lambda_.4
= control target key start
LH: loop header
LB: loop body
LE: loop exit
PB: predicated region body
PF: predicated region fallthrough
CT: control target
= control target key end

     0   :  { %vm432_vm0 = vcmask 261120   ;;  %s1314_s3 = inlined_call_operand.vmem [shape: bf16[128,128], index: 3, kind: input, shape index: {}]   ;;  %s1315_s2 = inlined_call_operand.vmem [shape: bf16[128,512], index: 2, kind: input, shape index: {}]   ;;  %s1316_s4 = inlined_call_operand.vmem [shape: f32[1,128], index: 4, kind: input, shape index: {}]   ;;  %s1317_s1 = inlined_call_operand.vmem [shape: bf16[32,128], index: 1, kind: input, shape index: {}]   ;;  %s1318_s0 = inlined_call_operand.vmem [shape: bf16[4,32,32], index: 0, kind: input, shape index: {}]   ;;  %s1319_s5 = inlined_call_operand.vmem [shape: f32[1,128], index: 5, kind: input, shape index: {}]   ;;  %s1320_s6 = inlined_call_operand.vmem [shape: f32[1,128], index: 6, kind: input, shape index: {}]   ;;  %s1321_s7 = inlined_call_operand.vmem [shape: f32[32,128], index: 7, kind: output, shape index: {}]  }
   0x1   :  { %v929_v0 = vld [vmem:[%s1314_s3 + $0x38] sm:$0xff]  ;;  %v854_v1 = vld [vmem:[%s1315_s2 + $0xe0] sm:$0xf]  ;;  %v960_v2 = vld [vmem:[%s1315_s2 + $0xec] sm:$0xf0] }
   0x2   :  { %v855_v3 = vor.u32 %v960_v2, %v854_v1  ;;  %v958_v4 = vld [vmem:[%s1315_s2 + $0xe4] sm:$0xf]  ;;  %v856_v5 = vld [vmem:[%s1315_s2 + $0xf0] sm:$0xf0]  ;;  %v862_v6 = vld [vmem:[%s1315_s2 + $0xe8] sm:$0xf]  ;;  %111 = vmatpush.bf16.msra.mxu0 %v929_v0 }
   0x3   :  { %v859_v7 = vor.u32 %v958_v4, %v856_v5  ;;  %v961_v8 = vld [vmem:[%s1315_s2 + $0xf4] sm:$0xf0]  ;;  %v928_v9 = vld [vmem:[%s1314_s3 + $0x30] sm:$0xff]  ;;  %v838_v10 = vld [vmem:[%s1315_s2 + $0xc0] sm:$0xf] }
   0x4   :  { %322 = vmatpush.bf16.msra.mxu1 %v855_v3  ;;  %v863_v11 = vor.u32 %v961_v8, %v862_v6  ;;  %v956_v12 = vld [vmem:[%s1315_s2 + $0xcc] sm:$0xf0]  ;;  %v954_v13 = vld [vmem:[%s1315_s2 + $0xc4] sm:$0xf]  ;;  %v840_v14 = vld [vmem:[%s1315_s2 + $0xd0] sm:$0xf0] }
   0x5   :  { %341 = vmatpush.bf16.msra.mxu2 %v859_v7  ;;  %v839_v15 = vor.u32 %v956_v12, %v838_v10  ;;  %v843_v16 = vor.u32 %v954_v13, %v840_v14  ;;  %v846_v17 = vld [vmem:[%s1315_s2 + $0xc8] sm:$0xf]  ;;  %v957_v18 = vld [vmem:[%s1315_s2 + $0xd4] sm:$0xf0]  ;;  %v822_v21 = vld [vmem:[%s1315_s2 + $0xa0] sm:$0xf] }
   0x6   :  { %v927_v19 = vld [vmem:[%s1314_s3 + $0x28] sm:$0xff]  ;;  %360 = vmatpush.bf16.msra.mxu3 %v863_v11  ;;  %v847_v20 = vor.u32 %v957_v18, %v846_v17  ;;  %v952_v22 = vld [vmem:[%s1315_s2 + $0xac] sm:$0xf0]  ;;  %v950_v23 = vld [vmem:[%s1315_s2 + $0xa4] sm:$0xf]  ;;  %112 = vmatpush.bf16.msra.mxu0 %v928_v9 }
   0x7   :  { %v824_v24 = vld [vmem:[%s1315_s2 + $0xb0] sm:$0xf0]  ;;  %v830_v25 = vld [vmem:[%s1315_s2 + $0xa8] sm:$0xf]  ;;  %v953_v26 = vld [vmem:[%s1315_s2 + $0xb4] sm:$0xf0]  ;;  %v823_v27 = vor.u32 %v952_v22, %v822_v21 }
   0x8   :  { %323 = vmatpush.bf16.msra.mxu1 %v839_v15  ;;  %v827_v28 = vor.u32 %v950_v23, %v824_v24  ;;  %v806_v29 = vld [vmem:[%s1315_s2 + $0x80] sm:$0xf]  ;;  %v948_v30 = vld [vmem:[%s1315_s2 + $0x8c] sm:$0xf0]  ;;  %v831_v31 = vor.u32 %v953_v26, %v830_v25  ;;  %v946_v32 = vld [vmem:[%s1315_s2 + $0x84] sm:$0xf] }
   0x9   :  { %342 = vmatpush.bf16.msra.mxu2 %v843_v16  ;;  %v808_v33 = vld [vmem:[%s1315_s2 + $0x90] sm:$0xf0]  ;;  %v926_v34 = vld [vmem:[%s1314_s3 + $0x20] sm:$0xff]  ;;  %v814_v35 = vld [vmem:[%s1315_s2 + $0x88] sm:$0xf]  ;;  %v807_v37 = vor.u32 %v948_v30, %v806_v29 }
   0xa   :  { %361 = vmatpush.bf16.msra.mxu3 %v847_v20  ;;  %113 = vmatpush.bf16.msra.mxu0 %v927_v19  ;;  %v949_v36 = vld [vmem:[%s1315_s2 + $0x94] sm:$0xf0]  ;;  %v811_v38 = vor.u32 %v946_v32, %v808_v33  ;;  %v790_v39 = vld [vmem:[%s1315_s2 + $0x60] sm:$0xf]  ;;  %v944_v40 = vld [vmem:[%s1315_s2 + $0x6c] sm:$0xf0] }
   0xb   :  { %v815_v41 = vor.u32 %v949_v36, %v814_v35  ;;  %v942_v42 = vld [vmem:[%s1315_s2 + $0x64] sm:$0xf]  ;;  %v792_v43 = vld [vmem:[%s1315_s2 + $0x70] sm:$0xf0]  ;;  %v925_v44 = vld [vmem:[%s1314_s3 + $0x18] sm:$0xff]  ;;  %v791_v47 = vor.u32 %v944_v40, %v790_v39 }
   0xc   :  { %324 = vmatpush.bf16.msra.mxu1 %v823_v27  ;;  %v798_v45 = vld [vmem:[%s1315_s2 + $0x68] sm:$0xf]  ;;  %v945_v46 = vld [vmem:[%s1315_s2 + $0x74] sm:$0xf0]  ;;  %v795_v48 = vor.u32 %v942_v42, %v792_v43  ;;  %v774_v49 = vld [vmem:[%s1315_s2 + $0x40] sm:$0xf] }
   0xd   :  { %343 = vmatpush.bf16.msra.mxu2 %v827_v28  ;;  %v940_v50 = vld [vmem:[%s1315_s2 + $0x4c] sm:$0xf0]  ;;  %v799_v51 = vor.u32 %v945_v46, %v798_v45  ;;  %v938_v52 = vld [vmem:[%s1315_s2 + $0x44] sm:$0xf]  ;;  %v776_v53 = vld [vmem:[%s1315_s2 + $0x50] sm:$0xf0] }
   0xe   :  { %362 = vmatpush.bf16.msra.mxu3 %v831_v31  ;;  %114 = vmatpush.bf16.msra.mxu0 %v926_v34  ;;  %v924_v54 = vld [vmem:[%s1314_s3 + $0x10] sm:$0xff]  ;;  %v782_v55 = vld [vmem:[%s1315_s2 + $0x48] sm:$0xf]  ;;  %v941_v56 = vld [vmem:[%s1315_s2 + $0x54] sm:$0xf0]  ;;  %v775_v57 = vor.u32 %v940_v50, %v774_v49  ;;  %v779_v58 = vor.u32 %v938_v52, %v776_v53 }
   0xf   :  { %v758_v59 = vld [vmem:[%s1315_s2 + $0x20] sm:$0xf]  ;;  %v936_v60 = vld [vmem:[%s1315_s2 + $0x2c] sm:$0xf0]  ;;  %v783_v61 = vor.u32 %v941_v56, %v782_v55  ;;  %v934_v62 = vld [vmem:[%s1315_s2 + $0x24] sm:$0xf] }
  0x10   :  { %325 = vmatpush.bf16.msra.mxu1 %v807_v37  ;;  %v760_v63 = vld [vmem:[%s1315_s2 + $0x30] sm:$0xf0]  ;;  %v923_v0 = vld [vmem:[%s1314_s3 + $0x8] sm:$0xff]  ;;  %v937_v2 = vld [vmem:[%s1315_s2 + $0x34] sm:$0xf0]  ;;  %v759_v3 = vor.u32 %v936_v60, %v758_v59 }
  0x11   :  { %344 = vmatpush.bf16.msra.mxu2 %v811_v38  ;;  %v766_v1 = vld [vmem:[%s1315_s2 + $0x28] sm:$0xf]  ;;  %v742_v4 = vld [vmem:[%s1315_s2] sm:$0xf]  ;;  %v932_v5 = vld [vmem:[%s1315_s2 + $0xc] sm:$0xf0]  ;;  %v763_v6 = vor.u32 %v934_v62, %v760_v63 }
  0x12   :  { %363 = vmatpush.bf16.msra.mxu3 %v815_v41  ;;  %115 = vmatpush.bf16.msra.mxu0 %v925_v44  ;;  %v959_v7 = vld [vmem:[%s1315_s2 + $0xec] sm:$0xf]  ;;  %v864_v8 = vld [vmem:[%s1315_s2 + $0xf8] sm:$0xf0]  ;;  %v767_v9 = vor.u32 %v937_v2, %v766_v1  ;;  %v930_v10 = vld [vmem:[%s1315_s2 + $0x4] sm:$0xf]  ;;  %v743_v15 = vor.u32 %v932_v5, %v742_v4 }
  0x13   :  { %v744_v11 = vld [vmem:[%s1315_s2 + $0x10] sm:$0xf0]  ;;  %v922_v12 = vld [vmem:[%s1314_s3] sm:$0xff]  ;;  %v750_v13 = vld [vmem:[%s1315_s2 + $0x8] sm:$0xf]  ;;  %v867_v16 = vor.u32 %v959_v7, %v864_v8 }
  0x14   :  { %326 = vmatpush.bf16.msra.mxu1 %v791_v47  ;;  %v933_v14 = vld [vmem:[%s1315_s2 + $0x14] sm:$0xf0]  ;;  %v747_v17 = vor.u32 %v930_v10, %v744_v11  ;;  %v955_v18 = vld [vmem:[%s1315_s2 + $0xcc] sm:$0xf]  ;;  %v848_v19 = vld [vmem:[%s1315_s2 + $0xd8] sm:$0xf0] }
  0x15   :  { %345 = vmatpush.bf16.msra.mxu2 %v795_v48  ;;  %v751_v20 = vor.u32 %v933_v14, %v750_v13  ;;  %v920_v21 = vld [vmem:[%s1317_s1] sm:$0xff]  ;;  %v851_v22 = vor.u32 %v955_v18, %v848_v19  ;;  %v951_v23 = vld [vmem:[%s1315_s2 + $0xac] sm:$0xf]  ;;  %v832_v24 = vld [vmem:[%s1315_s2 + $0xb8] sm:$0xf0] }
  0x16   :  { %364 = vmatpush.bf16.msra.mxu3 %v799_v51  ;;  %116 = vmatpush.bf16.msra.mxu0 %v924_v54  ;;  %v835_v25 = vor.u32 %v951_v23, %v832_v24  ;;  %v947_v26 = vld [vmem:[%s1315_s2 + $0x8c] sm:$0xf]  ;;  %v816_v27 = vld [vmem:[%s1315_s2 + $0x98] sm:$0xf0]  ;;  %v979_v42 = vld [vmem:[%s1316_s4] ss:$0 sm:$0xff] }
  0x17   :  { %v819_v28 = vor.u32 %v947_v26, %v816_v27  ;;  %v943_v29 = vld [vmem:[%s1315_s2 + $0x6c] sm:$0xf]  ;;  %v800_v30 = vld [vmem:[%s1315_s2 + $0x78] sm:$0xf0]  ;;  %v964_v23 = vld [vmem:[%s1318_s0 + $0x10] sm:$0xff] }
  0x18   :  { %327 = vmatpush.bf16.msra.mxu1 %v775_v57  ;;  %v803_v31 = vor.u32 %v943_v29, %v800_v30  ;;  %v939_v32 = vld [vmem:[%s1315_s2 + $0x4c] sm:$0xf]  ;;  %v784_v33 = vld [vmem:[%s1315_s2 + $0x58] sm:$0xf0] }
  0x19   :  { %346 = vmatpush.bf16.msra.mxu2 %v779_v58  ;;  %v921_v34 = vld [vmem:[%s1317_s1 + $0x8] sm:$0xff]  ;;  %v787_v35 = vor.u32 %v939_v32, %v784_v33  ;;  %v768_v37 = vld [vmem:[%s1315_s2 + $0x38] sm:$0xf0] }
  0x1a   :  { %365 = vmatpush.bf16.msra.mxu3 %v783_v61  ;;  %117 = vmatpush.bf16.msra.mxu0 %v923_v0  ;;  %v935_v36 = vld [vmem:[%s1315_s2 + $0x2c] sm:$0xf]  ;;  %v752_v40 = vld [vmem:[%s1315_s2 + $0x18] sm:$0xf0] }
  0x1b   :  { %v771_v38 = vor.u32 %v935_v36, %v768_v37  ;;  %v931_v39 = vld [vmem:[%s1315_s2 + $0xc] sm:$0xf]  ;;  %v966_v37 = vld [vmem:[%s1318_s0 + $0x20] sm:$0xff] }
  0x1c   :  { %328 = vmatpush.bf16.msra.mxu1 %v759_v3  ;;  %v755_v41 = vor.u32 %v931_v39, %v752_v40  ;;  %v963_v39 = vld [vmem:[%s1318_s0 + $0x8] sm:$0xff]  ;;  %v965_v40 = vld [vmem:[%s1318_s0 + $0x18] sm:$0xff] }
  0x1d   :  { %347 = vmatpush.bf16.msra.mxu2 %v763_v6 }
  0x1e   :  { %366 = vmatpush.bf16.msra.mxu3 %v767_v9  ;;  %118 = vmatpush.bf16.msra.mxu0 %v922_v12 }
  0x20   :  { %329 = vmatpush.bf16.msra.mxu1 %v743_v15 }
  0x21   :  { %348 = vmatpush.bf16.msra.mxu2 %v747_v17  ;;  %119 = vmatmul.bf16.vlgmr.msra.gmra.mxu0 %v920_v21 }
  0x22   :  { %379 = vmatpush.bf16.msrb.mxu0 %v867_v16  ;;  %367 = vmatpush.bf16.msra.mxu3 %v751_v20 }
  0x23   :  { %330 = vmatmul.bf16.vlgmr.msra.gmra.mxu1 %v920_v21 }
  0x24   :  { %970 = vmatpush.bf16.msrb.mxu1 %v867_v16  ;;  %349 = vmatmul.bf16.vlgmr.msra.gmra.mxu2 %v920_v21 }
  0x25   :  { %368 = vmatmul.bf16.vlgmr.msra.gmra.mxu3 %v920_v21 }
  0x26   :  { %380 = vmatpush.bf16.msrb.mxu0 %v851_v22 }
  0x28   :  { %971 = vmatpush.bf16.msrb.mxu1 %v851_v22  ;;  %v962_v22 = vld [vmem:[%s1318_s0] sm:$0xff] }
  0x2a   :  { %381 = vmatpush.bf16.msrb.mxu0 %v835_v25 }
  0x2c   :  { %972 = vmatpush.bf16.msrb.mxu1 %v835_v25 }
  0x2e   :  { %382 = vmatpush.bf16.msrb.mxu0 %v819_v28 }
  0x30   :  { %973 = vmatpush.bf16.msrb.mxu1 %v819_v28 }
  0x31   :  { %124 = vmatmul.bf16.gmra.mxu0 %v921_v34 }
  0x32   :  { %383 = vmatpush.bf16.msrb.mxu0 %v803_v31 }
  0x33   :  { %335 = vmatmul.bf16.gmra.mxu1 %v921_v34 }
  0x34   :  { %974 = vmatpush.bf16.msrb.mxu1 %v803_v31  ;;  %354 = vmatmul.bf16.gmra.mxu2 %v921_v34 }
  0x35   :  { %373 = vmatmul.bf16.gmra.mxu3 %v921_v34 }
  0x36   :  { %384 = vmatpush.bf16.msrb.mxu0 %v787_v35 }
  0x38   :  { %975 = vmatpush.bf16.msrb.mxu1 %v787_v35 }
  0x3a   :  { %385 = vmatpush.bf16.msrb.mxu0 %v771_v38 }
  0x3c   :  { %976 = vmatpush.bf16.msrb.mxu1 %v771_v38  ;;  %v968_v38 = vld [vmem:[%s1318_s0 + $0x30] sm:$0xff] }
  0x3e   :  { %386 = vmatpush.bf16.msrb.mxu0 %v755_v41 }
  0x40   :  { %977 = vmatpush.bf16.msrb.mxu1 %v755_v41  ;;  %v967_v41 = vld [vmem:[%s1318_s0 + $0x28] sm:$0xff] }
  0x41   :  { %387 = vmatmul.bf16.vlgmr.msrb.gmra.mxu0 %v920_v21 }
  0x43   :  { %392 = vmatmul.bf16.vlgmr.msrb.gmra.mxu1 %v921_v34 }
  0x9e   :  { %v120_v43 = vpop.f32.mrf.mxu0 }
  0x9f   :  { %v1252_v44 = vadd.f32 %v979_v42, %v120_v43 }
  0xa0   :  { %v331_v45 = vpop.f32.mrf.mxu1 }
  0xa6   :  { %v122_v47 = vpop.f32.mrf.mxu0 }
  0xa7   :  { %v350_v46 = vpop.f32.mrf.mxu2  ;;  %v1254_v48 = vadd.f32 %v979_v42, %v122_v47 }
  0xa8   :  { %v333_v49 = vpop.f32.mrf.mxu1  ;;  %v369_v50 = vpop.f32.mrf.mxu3  ;;  %v398_v3 = vpack.c.bf16 %v350_v46, %v331_v45 }
  0xaa   :  { %v424_v12 = vunpack.c.l.b16 %v398_v3  ;;  %v477_v13 = vunpack.c.h.b16 %v398_v3 }
  0xae   :  { %v125_v52 = vpop.f32.mrf.mxu0 }
  0xaf   :  { %v352_v51 = vpop.f32.mrf.mxu2  ;;  %v1256_v53 = vadd.f32 %v979_v42, %v125_v52 }
  0xb0   :  { %v336_v54 = vpop.f32.mrf.mxu1  ;;  %v371_v55 = vpop.f32.mrf.mxu3  ;;  %v400_v0 = vpack.c.bf16 %v352_v51, %v333_v49 }
  0xb2   :  { %v425_v8 = vunpack.c.l.b16 %v400_v0  ;;  %v478_v9 = vunpack.c.h.b16 %v400_v0 }
  0xb4   :  { %v428_v18 = vpack.c.b16 %v425_v8, %v424_v12  ;;  %v481_v19 = vpack.c.b16 %v478_v9, %v477_v13 }
  0xb6   :  { %v127_v57 = vpop.f32.mrf.mxu0 }
  0xb7   :  { %v355_v56 = vpop.f32.mrf.mxu2  ;;  %v1258_v58 = vadd.f32 %v979_v42, %v127_v57  ;;  %v969_v42 = vld [vmem:[%s1318_s0 + $0x38] sm:$0xff] }
  0xb8   :  { %v338_v59 = vpop.f32.mrf.mxu1  ;;  %v402_v60 = vpack.c.bf16 %v355_v56, %v336_v54  ;;  %v374_v61 = vpop.f32.mrf.mxu3 }
  0xba   :  { %v426_v4 = vunpack.c.l.b16 %v402_v60  ;;  %v479_v5 = vunpack.c.h.b16 %v402_v60 }
  0xbe   :  { %v388_v63 = vpop.f32.mrf.mxu0 }
  0xbf   :  { %v357_v62 = vpop.f32.mrf.mxu2  ;;  %v399_v24 = vpack.c.bf16 %v388_v63, %v369_v50 }
  0xc0   :  { %v404_v1 = vpack.c.bf16 %v357_v62, %v338_v59  ;;  %v393_v2 = vpop.f32.mrf.mxu1  ;;  %v376_v16 = vpop.f32.mrf.mxu3 }
  0xc1   :  { %v403_v14 = vpack.c.bf16 %v393_v2, %v374_v61  ;;  %v533_v33 = vunpack.c.l.b16 %v399_v24  ;;  %v585_v34 = vunpack.c.h.b16 %v399_v24 }
  0xc2   :  { %v427_v6 = vunpack.c.l.b16 %v404_v1  ;;  %v480_v7 = vunpack.c.h.b16 %v404_v1 }
  0xc3   :  { %v535_v25 = vunpack.c.l.b16 %v403_v14  ;;  %v587_v26 = vunpack.c.h.b16 %v403_v14 }
  0xc4   :  { %v429_v10 = vpack.c.b16 %v427_v6, %v426_v4  ;;  %v482_v11 = vpack.c.b16 %v480_v7, %v479_v5  ;;  %v986_v4 = vmov 32.0  }
  0xc5   :  { %982 = vrcp.f32 %v986_v4 }
  0xc6   :  { %445 = vmatpush.bf16.msra.mxu1 %v429_v10  ;;  %497 = vmatpush.bf16.msrb.mxu2 %v482_v11  ;;  %v390_v15 = vpop.f32.mrf.mxu0 }
  0xc7   :  { %v401_v20 = vpack.c.bf16 %v390_v15, %v371_v55 }
  0xc8   :  { %v395_v17 = vpop.f32.mrf.mxu1 }
  0xc9   :  { %v405_v21 = vpack.c.bf16 %v395_v17, %v376_v16  ;;  %v534_v29 = vunpack.c.l.b16 %v401_v20  ;;  %v586_v30 = vunpack.c.h.b16 %v401_v20 }
  0xca   :  { %446 = vmatpush.bf16.msra.mxu1 %v428_v18  ;;  %498 = vmatpush.bf16.msrb.mxu2 %v481_v19 }
  0xcb   :  { %v536_v27 = vunpack.c.l.b16 %v405_v21  ;;  %v588_v28 = vunpack.c.h.b16 %v405_v21  ;;  %v537_v35 = vpack.c.b16 %v534_v29, %v533_v33  ;;  %v589_v36 = vpack.c.b16 %v586_v30, %v585_v34  ;;  %v983_v9 = vpop.eup %982 }
  0xcc   :  { %v634_v14 = vmul.f32 32.0, %v983_v9  ;;  %vm638_vm1 = vweird.f32 %v983_v9 }
  0xcd   :  { %v590_v31 = vpack.c.b16 %v588_v28, %v587_v26  ;;  %876 = vmatmul.msk.bf16.vlgmr.msra.gmra.mxu1 %vm432_vm0, %v962_v22  ;;  %890 = vmatmul.msk.bf16.vlgmr.msrb.gmra.mxu2 %vm432_vm0, %v964_v23  ;;  %v538_v32 = vpack.c.b16 %v536_v27, %v535_v25 }
  0xce   :  { %v635_v17 = vsub.f32 1.0, %v634_v14 }
  0xcf   :  { %553 = vmatpush.bf16.msrb.mxu3 %v538_v32  ;;  %605 = vmatpush.bf16.msra.mxu0 %v590_v31 }
  0xd0   :  { %v636_v20 = vmul.f32 %v983_v9, %v635_v17 }
  0xd2   :  { %v637_v23 = vadd.f32 %v983_v9, %v636_v20 }
  0xd3   :  { %554 = vmatpush.bf16.msrb.mxu3 %v537_v35  ;;  %606 = vmatpush.bf16.msra.mxu0 %v589_v36 }
  0xd4   :  { %v639_v26 = vsel %vm638_vm1, %v983_v9, %v637_v23 }
  0xd6   :  { %904 = vmatmul.msk.bf16.vlgmr.msrb.gmra.mxu3 %vm432_vm0, %v966_v37  ;;  %918 = vmatmul.msk.bf16.vlgmr.msra.gmra.mxu0 %vm432_vm0, %v968_v38 }
  0xdd   :  { %877 = vmatmul.msk.bf16.gmra.mxu1 %vm432_vm0, %v963_v39  ;;  %891 = vmatmul.msk.bf16.gmra.mxu2 %vm432_vm0, %v965_v40 }
  0xe6   :  { %905 = vmatmul.msk.bf16.gmra.mxu3 %vm432_vm0, %v967_v41  ;;  %919 = vmatmul.msk.bf16.gmra.mxu0 %vm432_vm0, %v969_v42 }
 0x14a   :  { %v448_v43 = vpop.f32.mrf.mxu1 }
 0x14b   :  { %v458_v51 = vadd.f32 %v448_v43, %v1252_v44 }
 0x150   :  { %v500_v45 = vpop.f32.mrf.mxu2 }
 0x151   :  { %v510_v52 = vadd.f32 %v500_v45, %v458_v51 }
 0x152   :  { %v450_v47 = vpop.f32.mrf.mxu1 }
 0x153   :  { %v608_v46 = vpop.f32.mrf.mxu0  ;;  %v459_v54 = vadd.f32 %v450_v47, %v1254_v48 }
 0x158   :  { %v502_v49 = vpop.f32.mrf.mxu2 }
 0x159   :  { %v556_v50 = vpop.f32.mrf.mxu3  ;;  %v511_v56 = vadd.f32 %v502_v49, %v459_v54 }
 0x15a   :  { %v566_v57 = vadd.f32 %v556_v50, %v510_v52  ;;  %v453_v59 = vpop.f32.mrf.mxu1 }
 0x15b   :  { %v610_v55 = vpop.f32.mrf.mxu0  ;;  %v460_v1 = vadd.f32 %v453_v59, %v1256_v53 }
 0x15c   :  { %v618_v63 = vadd.f32 %v608_v46, %v566_v57 }
 0x160   :  { %v505_v62 = vpop.f32.mrf.mxu2 }
 0x161   :  { %v558_v60 = vpop.f32.mrf.mxu3  ;;  %v512_v3 = vadd.f32 %v505_v62, %v460_v1 }
 0x162   :  { %v567_v61 = vadd.f32 %v558_v60, %v511_v56  ;;  %v455_v7 = vpop.f32.mrf.mxu1  ;;  %v980_v56 = vld [vmem:[%s1319_s5] ss:$0 sm:$0xff] }
 0x163   :  { %v613_v44 = vpop.f32.mrf.mxu0  ;;  %v461_v10 = vadd.f32 %v455_v7, %v1258_v58 }
 0x164   :  { %v619_v0 = vadd.f32 %v610_v55, %v567_v61 }
 0x166   :  { %v624_v2 = vadd.f32 %v619_v0, %v618_v63 }
 0x168   :  { %v507_v8 = vpop.f32.mrf.mxu2 }
 0x169   :  { %v561_v5 = vpop.f32.mrf.mxu3  ;;  %v513_v12 = vadd.f32 %v507_v8, %v461_v10 }
 0x16a   :  { %v568_v6 = vadd.f32 %v561_v5, %v512_v3 }
 0x16b   :  { %v615_v16 = vpop.f32.mrf.mxu0 }
 0x16c   :  { %v620_v48 = vadd.f32 %v613_v44, %v568_v6 }
 0x16e   :  { %v625_v11 = vadd.f32 %v624_v2, %v620_v48 }
 0x171   :  { %v563_v13 = vpop.f32.mrf.mxu3 }
 0x172   :  { %v569_v15 = vadd.f32 %v563_v13, %v513_v12 }
 0x174   :  { %v621_v53 = vadd.f32 %v615_v16, %v569_v15 }
 0x176   :  { %v626_v18 = vadd.f32 %v625_v11, %v621_v53 }
 0x178   :  { %v627_v19 = vrot.slane %v626_v18, 4 }
 0x17a   :  { %v628_v21 = vadd.f32 %v627_v19, %v626_v18 }
 0x17c   :  { %v629_v22 = vrot.slane %v628_v21, 2 }
 0x17e   :  { %v630_v24 = vadd.f32 %v629_v22, %v628_v21 }
 0x180   :  { %v631_v25 = vrot.slane %v630_v24, 1 }
 0x182   :  { %v632_v27 = vadd.f32 %v631_v25, %v630_v24 }
 0x184   :  { %v640_v58 = vmul.f32 %v639_v26, %v632_v27 }
 0x186   :  { %v641_v28 = vsub.f32 %v618_v63, %v640_v58  ;;  %v642_v29 = vsub.f32 %v619_v0, %v640_v58  ;;  %v643_v30 = vsub.f32 %v620_v48, %v640_v58  ;;  %v644_v31 = vsub.f32 %v621_v53, %v640_v58  ;;  %v981_v63 = vld [vmem:[%s1320_s6] ss:$0 sm:$0xff] }
 0x188   :  { %v645_v32 = vmul.f32 %v641_v28, %v641_v28  ;;  %v646_v33 = vmul.f32 %v642_v29, %v642_v29  ;;  %v647_v34 = vmul.f32 %v643_v30, %v643_v30  ;;  %v648_v36 = vmul.f32 %v644_v31, %v644_v31 }
 0x18a   :  { %v649_v35 = vadd.f32 %v646_v33, %v645_v32 }
 0x18c   :  { %v650_v37 = vadd.f32 %v649_v35, %v647_v34 }
 0x18e   :  { %v651_v38 = vadd.f32 %v650_v37, %v648_v36 }
 0x190   :  { %v652_v39 = vrot.slane %v651_v38, 4 }
 0x192   :  { %v653_v40 = vadd.f32 %v652_v39, %v651_v38 }
 0x194   :  { %v654_v41 = vrot.slane %v653_v40, 2 }
 0x196   :  { %v655_v42 = vadd.f32 %v654_v41, %v653_v40 }
 0x198   :  { %v656_v43 = vrot.slane %v655_v42, 1 }
 0x19a   :  { %v657_v45 = vadd.f32 %v656_v43, %v655_v42 }
 0x19c   :  { %v658_v46 = vmul.f32 %v657_v45, %v639_v26 }
 0x19e   :  { %v659_v47 = vadd.f32 1e-05, %v658_v46 }
 0x1a0   :  { %984 = vrsqrt.f32 %v659_v47  ;;  %vm666_vm3 = vweird.f32 %v659_v47 }
 0x1a6   :  { %v985_v49 = vpop.eup %984 }
 0x1a7   :  { %v661_v50 = vmul.f32 %v985_v49, %v659_v47  ;;  %vm667_vm2 = vweird.f32 %v985_v49 }
 0x1a8   :  { %vm668_vm4 = vmor %vm666_vm3, %vm667_vm2 }
 0x1a9   :  { %v662_v51 = vmul.f32 %v985_v49, %v661_v50 }
 0x1ab   :  { %v663_v52 = vmul.f32 0.5, %v662_v51 }
 0x1ad   :  { %v664_v54 = vsub.f32 1.5, %v663_v52 }
 0x1af   :  { %v665_v55 = vmul.f32 %v985_v49, %v664_v54 }
 0x1b1   :  { %v669_v57 = vsel %vm668_vm4, %v985_v49, %v665_v55 }
 0x1b2   :  { %v670_v59 = vmul.f32 %v669_v57, %v641_v28  ;;  %v671_v60 = vmul.f32 %v669_v57, %v642_v29  ;;  %v672_v61 = vmul.f32 %v669_v57, %v643_v30  ;;  %v673_v62 = vmul.f32 %v669_v57, %v644_v31 }
 0x1b4   :  { %v677_v0 = vmul.f32 %v980_v56, %v670_v59  ;;  %v678_v1 = vmul.f32 %v980_v56, %v671_v60  ;;  %v679_v2 = vmul.f32 %v980_v56, %v672_v61  ;;  %v680_v3 = vmul.f32 %v980_v56, %v673_v62 }
 0x1b6   :  { %v684_v4 = vadd.f32 %v981_v63, %v677_v0  ;;  %v685_v5 = vadd.f32 %v981_v63, %v678_v1  ;;  %v686_v44 = vadd.f32 %v981_v63, %v679_v2  ;;  %v687_v6 = vadd.f32 %v981_v63, %v680_v3 }
 0x1b8   :  { %v688_v7 = vmax.f32 %v684_v4, 0.0  ;;  %v689_v48 = vmax.f32 %v685_v5, 0.0  ;;  %v690_v8 = vmax.f32 %v686_v44, 0.0  ;;  %v691_v9 = vmax.f32 %v687_v6, 0.0 }
 0x1ba   :  { %692 = vst [vmem:[%s1321_s7] sm:$0xff] %v688_v7 }
 0x1bb   :  { %693 = vst [vmem:[%s1321_s7 + $0x8] sm:$0xff] %v689_v48 }
 0x1bc   :  { %694 = vst [vmem:[%s1321_s7 + $0x10] sm:$0xff] %v690_v8 }
 0x1bd   :  { %695 = vst [vmem:[%s1321_s7 + $0x18] sm:$0xff] %v691_v9 }

// kernel: _lambda_.5
= control target key start
LH: loop header
LB: loop body
LE: loop exit
PB: predicated region body
PF: predicated region fallthrough
CT: control target
= control target key end

     0   :  { %v2253_v50 = vmov 16.0   ;;  %s3276_s3 = inlined_call_operand.vmem [shape: bf16[128,512], index: 3, kind: input, shape index: {}]   ;;  %s3277_s0 = inlined_call_operand.vmem [shape: f32[16,128], index: 0, kind: input, shape index: {}]   ;;  %s3278_s1 = inlined_call_operand.vmem [shape: f32[1,128], index: 1, kind: input, shape index: {}]   ;;  %s3279_s2 = inlined_call_operand.vmem [shape: f32[1,128], index: 2, kind: input, shape index: {}]   ;;  %s3280_s7 = inlined_call_operand.vmem [shape: bf16[512,256], index: 7, kind: input, shape index: {}]   ;;  %s3281_s4 = inlined_call_operand.vmem [shape: f32[1,512], index: 4, kind: input, shape index: {}]   ;;  %s3282_s5 = inlined_call_operand.vmem [shape: f32[1,512], index: 5, kind: input, shape index: {}]   ;;  %s3283_s6 = inlined_call_operand.vmem [shape: f32[1,512], index: 6, kind: input, shape index: {}]   ;;  %s3284_s12 = inlined_call_operand.vmem [shape: f32[1,128], index: 12, kind: input, shape index: {}]   ;;  %s3285_s8 = inlined_call_operand.vmem [shape: f32[1,256], index: 8, kind: input, shape index: {}]   ;;  %s3286_s11 = inlined_call_operand.vmem [shape: bf16[256,128], index: 11, kind: input, shape index: {}]   ;;  %s3287_s9 = inlined_call_operand.vmem [shape: f32[1,256], index: 9, kind: input, shape index: {}]   ;;  %s3288_s10 = inlined_call_operand.vmem [shape: f32[1,256], index: 10, kind: input, shape index: {}]   ;;  %s3289_s13 = inlined_call_operand.vmem [shape: f32[1,128], index: 13, kind: input, shape index: {}]   ;;  %s3290_s14 = inlined_call_operand.vmem [shape: f32[1,128], index: 14, kind: input, shape index: {}]   ;;  %s3291_s16 = inlined_call_operand.vmem [shape: f32[1,128], index: 16, kind: input, shape index: {}]   ;;  %s3292_s15 = inlined_call_operand.vmem [shape: bf16[128,128], index: 15, kind: input, shape index: {}]   ;;  %s3293_s17 = inlined_call_operand.vmem [shape: f32[1,128], index: 17, kind: input, shape index: {}]   ;;  %s3294_s18 = inlined_call_operand.vmem [shape: f32[1,128], index: 18, kind: input, shape index: {}]   ;;  %s3295_s20 = inlined_call_operand.vmem [shape: f32[1,128], index: 20, kind: input, shape index: {}]   ;;  %s3296_s19 = inlined_call_operand.vmem [shape: bf16[128,128], index: 19, kind: input, shape index: {}]   ;;  %s3297_s21 = inlined_call_operand.vmem [shape: f32[16,128], index: 21, kind: output, shape index: {}]  }
   0x1   :  { %3301 = sst [smem:[#allocation2_spill]] %s3276_s3  ;;  %2233 = vrcp.f32 %v2253_v50 }
   0x2   :  { %3302 = sst [smem:[#allocation3_spill]] %s3277_s0 }
   0x3   :  { %3303 = sst [smem:[#allocation4_spill]] %s3278_s1 }
   0x4   :  { %3304 = sst [smem:[#allocation5_spill]] %s3279_s2 }
   0x5   :  { %3305 = sst [smem:[#allocation6_spill]] %s3280_s7 }
   0x6   :  { %3306 = sst [smem:[#allocation7_spill]] %s3281_s4 }
   0x7   :  { %s3307_s26 = sld [smem:[#allocation2_spill]] }
   0x8   :  { %s3308_s1 = sld [smem:[#allocation3_spill]] }
   0x9   :  { %s3309_s30 = sld [smem:[#allocation4_spill]] }
   0xa   :  { %s3310_s23 = sld [smem:[#allocation5_spill]] }
   0xd   :  { %v1697_v0 = vld [vmem:[%s3307_s26 + $0xe0] sm:$0xf]  ;;  %v2125_v1 = vld [vmem:[%s3307_s26 + $0xec] sm:$0xf0]  ;;  %v2123_v2 = vld [vmem:[%s3307_s26 + $0xe4] sm:$0xf] }
   0xe   :  { %v1698_v3 = vor.u32 %v2125_v1, %v1697_v0  ;;  %v1699_v4 = vld [vmem:[%s3307_s26 + $0xf0] sm:$0xf0]  ;;  %v1705_v5 = vld [vmem:[%s3307_s26 + $0xe8] sm:$0xf]  ;;  %v2126_v6 = vld [vmem:[%s3307_s26 + $0xf4] sm:$0xf0] }
   0xf   :  { %v1702_v7 = vor.u32 %v2123_v2, %v1699_v4  ;;  %v1706_v8 = vor.u32 %v2126_v6, %v1705_v5  ;;  %v2124_v9 = vld [vmem:[%s3307_s26 + $0xec] sm:$0xf]  ;;  %v1707_v10 = vld [vmem:[%s3307_s26 + $0xf8] sm:$0xf0]  ;;  %v1681_v11 = vld [vmem:[%s3307_s26 + $0xc0] sm:$0xf] }
  0x10   :  { %327 = vmatpush.bf16.msra.mxu0 %v1698_v3  ;;  %v1710_v12 = vor.u32 %v2124_v9, %v1707_v10  ;;  %v2121_v13 = vld [vmem:[%s3307_s26 + $0xcc] sm:$0xf0]  ;;  %v2119_v14 = vld [vmem:[%s3307_s26 + $0xc4] sm:$0xf]  ;;  %v1683_v15 = vld [vmem:[%s3307_s26 + $0xd0] sm:$0xf0]  ;;  %v2502_v3 = vpop.eup %2233 }
  0x11   :  { %341 = vmatpush.bf16.msra.mxu1 %v1702_v7  ;;  %355 = vmatpush.bf16.msra.mxu2 %v1706_v8  ;;  %v1682_v16 = vor.u32 %v2121_v13, %v1681_v11  ;;  %v1686_v17 = vor.u32 %v2119_v14, %v1683_v15  ;;  %v1689_v18 = vld [vmem:[%s3307_s26 + $0xc8] sm:$0xf]  ;;  %v2122_v19 = vld [vmem:[%s3307_s26 + $0xd4] sm:$0xf0]  ;;  %v2120_v20 = vld [vmem:[%s3307_s26 + $0xcc] sm:$0xf]  ;;  %vm84_vm0 = vweird.f32 %v2502_v3 }
  0x12   :  { %369 = vmatpush.bf16.msra.mxu3 %v1710_v12  ;;  %v1690_v21 = vor.u32 %v2122_v19, %v1689_v18  ;;  %v1691_v22 = vld [vmem:[%s3307_s26 + $0xd8] sm:$0xf0]  ;;  %v1665_v23 = vld [vmem:[%s3307_s26 + $0xa0] sm:$0xf]  ;;  %v2117_v24 = vld [vmem:[%s3307_s26 + $0xac] sm:$0xf0] }
  0x13   :  { %v1694_v25 = vor.u32 %v2120_v20, %v1691_v22  ;;  %v2115_v26 = vld [vmem:[%s3307_s26 + $0xa4] sm:$0xf]  ;;  %v1667_v27 = vld [vmem:[%s3307_s26 + $0xb0] sm:$0xf0]  ;;  %v1673_v28 = vld [vmem:[%s3307_s26 + $0xa8] sm:$0xf]  ;;  %v1666_v29 = vor.u32 %v2117_v24, %v1665_v23 }
  0x14   :  { %328 = vmatpush.bf16.msra.mxu0 %v1682_v16  ;;  %v2118_v30 = vld [vmem:[%s3307_s26 + $0xb4] sm:$0xf0]  ;;  %v2116_v31 = vld [vmem:[%s3307_s26 + $0xac] sm:$0xf]  ;;  %v1675_v32 = vld [vmem:[%s3307_s26 + $0xb8] sm:$0xf0]  ;;  %v1670_v33 = vor.u32 %v2115_v26, %v1667_v27 }
  0x15   :  { %342 = vmatpush.bf16.msra.mxu1 %v1686_v17  ;;  %356 = vmatpush.bf16.msra.mxu2 %v1690_v21  ;;  %v1674_v34 = vor.u32 %v2118_v30, %v1673_v28  ;;  %v1649_v35 = vld [vmem:[%s3307_s26 + $0x80] sm:$0xf]  ;;  %v2113_v36 = vld [vmem:[%s3307_s26 + $0x8c] sm:$0xf0]  ;;  %v2111_v37 = vld [vmem:[%s3307_s26 + $0x84] sm:$0xf]  ;;  %v1678_v38 = vor.u32 %v2116_v31, %v1675_v32 }
  0x16   :  { %370 = vmatpush.bf16.msra.mxu3 %v1694_v25  ;;  %v1651_v39 = vld [vmem:[%s3307_s26 + $0x90] sm:$0xf0]  ;;  %v1657_v40 = vld [vmem:[%s3307_s26 + $0x88] sm:$0xf]  ;;  %v2114_v41 = vld [vmem:[%s3307_s26 + $0x94] sm:$0xf0]  ;;  %v1650_v44 = vor.u32 %v2113_v36, %v1649_v35 }
  0x17   :  { %v2112_v42 = vld [vmem:[%s3307_s26 + $0x8c] sm:$0xf]  ;;  %v1659_v43 = vld [vmem:[%s3307_s26 + $0x98] sm:$0xf0]  ;;  %v1654_v45 = vor.u32 %v2111_v37, %v1651_v39  ;;  %v1658_v46 = vor.u32 %v2114_v41, %v1657_v40  ;;  %v1633_v47 = vld [vmem:[%s3307_s26 + $0x60] sm:$0xf] }
  0x18   :  { %329 = vmatpush.bf16.msra.mxu0 %v1666_v29  ;;  %v2109_v48 = vld [vmem:[%s3307_s26 + $0x6c] sm:$0xf0]  ;;  %v2107_v49 = vld [vmem:[%s3307_s26 + $0x64] sm:$0xf]  ;;  %v1662_v51 = vor.u32 %v2112_v42, %v1659_v43  ;;  %v1635_v52 = vld [vmem:[%s3307_s26 + $0x70] sm:$0xf0] }
  0x19   :  { %343 = vmatpush.bf16.msra.mxu1 %v1670_v33  ;;  %357 = vmatpush.bf16.msra.mxu2 %v1674_v34  ;;  %v1641_v53 = vld [vmem:[%s3307_s26 + $0x68] sm:$0xf]  ;;  %v2110_v54 = vld [vmem:[%s3307_s26 + $0x74] sm:$0xf0]  ;;  %v2108_v55 = vld [vmem:[%s3307_s26 + $0x6c] sm:$0xf]  ;;  %v1634_v57 = vor.u32 %v2109_v48, %v1633_v47  ;;  %v1638_v58 = vor.u32 %v2107_v49, %v1635_v52 }
  0x1a   :  { %371 = vmatpush.bf16.msra.mxu3 %v1678_v38  ;;  %v1643_v56 = vld [vmem:[%s3307_s26 + $0x78] sm:$0xf0]  ;;  %v1642_v59 = vor.u32 %v2110_v54, %v1641_v53  ;;  %v1617_v60 = vld [vmem:[%s3307_s26 + $0x40] sm:$0xf]  ;;  %v2105_v61 = vld [vmem:[%s3307_s26 + $0x4c] sm:$0xf0] }
  0x1b   :  { %v2103_v62 = vld [vmem:[%s3307_s26 + $0x44] sm:$0xf]  ;;  %v1646_v63 = vor.u32 %v2108_v55, %v1643_v56  ;;  %v1619_v0 = vld [vmem:[%s3307_s26 + $0x50] sm:$0xf0]  ;;  %v1625_v1 = vld [vmem:[%s3307_s26 + $0x48] sm:$0xf]  ;;  %v1618_v6 = vor.u32 %v2105_v61, %v1617_v60 }
  0x1c   :  { %330 = vmatpush.bf16.msra.mxu0 %v1650_v44  ;;  %v2106_v2 = vld [vmem:[%s3307_s26 + $0x54] sm:$0xf0]  ;;  %v2104_v4 = vld [vmem:[%s3307_s26 + $0x4c] sm:$0xf]  ;;  %v1627_v5 = vld [vmem:[%s3307_s26 + $0x58] sm:$0xf0]  ;;  %v1622_v10 = vor.u32 %v2103_v62, %v1619_v0 }
  0x1d   :  { %344 = vmatpush.bf16.msra.mxu1 %v1654_v45  ;;  %358 = vmatpush.bf16.msra.mxu2 %v1658_v46  ;;  %v1601_v7 = vld [vmem:[%s3307_s26 + $0x20] sm:$0xf]  ;;  %v2101_v8 = vld [vmem:[%s3307_s26 + $0x2c] sm:$0xf0]  ;;  %v2099_v9 = vld [vmem:[%s3307_s26 + $0x24] sm:$0xf]  ;;  %v1626_v11 = vor.u32 %v2106_v2, %v1625_v1  ;;  %v1630_v15 = vor.u32 %v2104_v4, %v1627_v5 }
  0x1e   :  { %372 = vmatpush.bf16.msra.mxu3 %v1662_v51  ;;  %v1603_v12 = vld [vmem:[%s3307_s26 + $0x30] sm:$0xf0]  ;;  %v1609_v13 = vld [vmem:[%s3307_s26 + $0x28] sm:$0xf]  ;;  %v2102_v14 = vld [vmem:[%s3307_s26 + $0x34] sm:$0xf0]  ;;  %v1602_v22 = vor.u32 %v2101_v8, %v1601_v7 }
  0x1f   :  { %v2100_v16 = vld [vmem:[%s3307_s26 + $0x2c] sm:$0xf]  ;;  %v68_v17 = vld [vmem:[%s3308_s1] sm:$0xff]  ;;  %v80_v19 = vmul.f32 16.0, %v2502_v3  ;;  %v1611_v20 = vld [vmem:[%s3307_s26 + $0x38] sm:$0xf0]  ;;  %v1606_v25 = vor.u32 %v2099_v9, %v1603_v12  ;;  %v1610_v26 = vor.u32 %v2102_v14, %v1609_v13 }
  0x20   :  { %331 = vmatpush.bf16.msra.mxu0 %v1634_v57  ;;  %v69_v18 = vld [vmem:[%s3308_s1 + $0x8] sm:$0xff]  ;;  %v1585_v23 = vld [vmem:[%s3307_s26] sm:$0xf]  ;;  %v2097_v27 = vld [vmem:[%s3307_s26 + $0xc] sm:$0xf0]  ;;  %v1614_v30 = vor.u32 %v2100_v16, %v1611_v20  ;;  %s3311_s1 = sld [smem:[#allocation6_spill]] }
  0x21   :  { %345 = vmatpush.bf16.msra.mxu1 %v1638_v58  ;;  %359 = vmatpush.bf16.msra.mxu2 %v1642_v59  ;;  %v72_v21 = vadd.f32 %v69_v18, %v68_v17  ;;  %v81_v24 = vsub.f32 1.0, %v80_v19  ;;  %v2095_v28 = vld [vmem:[%s3307_s26 + $0x4] sm:$0xf]  ;;  %v1587_v31 = vld [vmem:[%s3307_s26 + $0x10] sm:$0xf0]  ;;  %v1586_v38 = vor.u32 %v2097_v27, %v1585_v23 }
  0x22   :  { %373 = vmatpush.bf16.msra.mxu3 %v1646_v63  ;;  %v1593_v32 = vld [vmem:[%s3307_s26 + $0x8] sm:$0xf]  ;;  %v2098_v33 = vld [vmem:[%s3307_s26 + $0x14] sm:$0xf0]  ;;  %v2096_v35 = vld [vmem:[%s3307_s26 + $0xc] sm:$0xf]  ;;  %v1590_v39 = vor.u32 %v2095_v28, %v1587_v31 }
  0x23   :  { %v73_v29 = vrot.slane %v72_v21, 4  ;;  %v82_v34 = vmul.f32 %v2502_v3, %v81_v24  ;;  %v1595_v36 = vld [vmem:[%s3307_s26 + $0x18] sm:$0xf0]  ;;  %v1594_v40 = vor.u32 %v2098_v33, %v1593_v32  ;;  %v2224_v4 = vld [vmem:[%s3309_s30] ss:$0 sm:$0xff]  ;;  %s3312_s30 = sld [smem:[#allocation7_spill]] }
  0x24   :  { %332 = vmatpush.bf16.msra.mxu0 %v1618_v6  ;;  %v1598_v42 = vor.u32 %v2096_v35, %v1595_v36  ;;  %v2225_v8 = vld [vmem:[%s3310_s23] ss:$0 sm:$0xff] }
  0x25   :  { %346 = vmatpush.bf16.msra.mxu1 %v1622_v10  ;;  %360 = vmatpush.bf16.msra.mxu2 %v1626_v11  ;;  %v74_v37 = vadd.f32 %v73_v29, %v72_v21  ;;  %v83_v43 = vadd.f32 %v2502_v3, %v82_v34 }
  0x26   :  { %374 = vmatpush.bf16.msra.mxu3 %v1630_v15  ;;  %v2142_v19 = vld [vmem:[%s3311_s1 + $0x74] sm:$0xf0]  ;;  %v1833_v20 = vld [vmem:[%s3311_s1 + $0xf0] sm:$0xf]  ;;  %v1761_v27 = vld [vmem:[%s3311_s1 + $0x60] sm:$0xf] }
  0x27   :  { %v75_v41 = vrot.slane %v74_v37, 2  ;;  %v2569_v46 = vsel %vm84_vm0, %v2502_v3, %v83_v43  ;;  %v2140_v28 = vld [vmem:[%s3311_s1 + $0x64] sm:$0xf0]  ;;  %v1825_v29 = vld [vmem:[%s3311_s1 + $0xe0] sm:$0xf] }
  0x28   :  { %333 = vmatpush.bf16.msra.mxu0 %v1602_v22  ;;  %v2158_v22 = vld [vmem:[%s3311_s1 + $0xf4] sm:$0xf0]  ;;  %v2156_v31 = vld [vmem:[%s3311_s1 + $0xe4] sm:$0xf0]  ;;  %v1897_v33 = vld [vmem:[%s3311_s1 + $0x170] sm:$0xf] }
  0x29   :  { %347 = vmatpush.bf16.msra.mxu1 %v1606_v25  ;;  %361 = vmatpush.bf16.msra.mxu2 %v1610_v26  ;;  %v76_v44 = vadd.f32 %v75_v41, %v74_v37  ;;  %v2594_v23 = vld [vmem:[%s3312_s30] sm:$0xf]  ;;  %v1834_v24 = vor.u32 %v2158_v22, %v1833_v20  ;;  %v1826_v32 = vor.u32 %v2156_v31, %v1825_v29  ;;  %v2174_v34 = vld [vmem:[%s3311_s1 + $0x174] sm:$0xf0]  ;;  %v1961_v35 = vld [vmem:[%s3311_s1 + $0x1f0] sm:$0xf] }
  0x2a   :  { %375 = vmatpush.bf16.msra.mxu3 %v1614_v30  ;;  %v159_v25 = vperm.slane %v2594_v23, 0  ;;  %v160_v26 = vperm.slane %v2594_v23, 1  ;;  %v1762_v30 = vor.u32 %v2140_v28, %v1761_v27  ;;  %v2190_v41 = vld [vmem:[%s3311_s1 + $0x1f4] sm:$0xf0]  ;;  %v1737_v22 = vld [vmem:[%s3311_s1 + $0x30] sm:$0xf] }
  0x2b   :  { %v77_v45 = vrot.slane %v76_v44, 1  ;;  %v2150_v28 = vld [vmem:[%s3311_s1 + $0xb4] sm:$0xf0] }
  0x2c   :  { %334 = vmatpush.bf16.msra.mxu0 %v1586_v38 }
  0x2d   :  { %348 = vmatpush.bf16.msra.mxu1 %v1590_v39  ;;  %362 = vmatpush.bf16.msra.mxu2 %v1594_v40  ;;  %v78_v47 = vadd.f32 %v77_v45, %v76_v44  ;;  %v1898_v40 = vor.u32 %v2174_v34, %v1897_v33  ;;  %v1962_v44 = vor.u32 %v2190_v41, %v1961_v35  ;;  %v1753_v45 = vld [vmem:[%s3311_s1 + $0x50] sm:$0xf]  ;;  %v2168_v33 = vld [vmem:[%s3311_s1 + $0x144] sm:$0xf0]  ;;  %v1937_v34 = vld [vmem:[%s3311_s1 + $0x1c0] sm:$0xf] }
  0x2e   :  { %376 = vmatpush.bf16.msra.mxu3 %v1598_v42 }
  0x2f   :  { %v86_v48 = vmul.f32 %v2569_v46, %v78_v47  ;;  %v2138_v47 = vld [vmem:[%s3311_s1 + $0x54] sm:$0xf0] }
  0x31   :  { %v87_v49 = vsub.f32 %v68_v17, %v86_v48  ;;  %v88_v50 = vsub.f32 %v69_v18, %v86_v48  ;;  %v1769_v18 = vld [vmem:[%s3311_s1 + $0x70] sm:$0xf]  ;;  %967 = vmatpush.bf16.msrb.mxu1 %v1834_v24  ;;  %981 = vmatpush.bf16.msrb.mxu2 %v1898_v40  ;;  %v2184_v40 = vld [vmem:[%s3311_s1 + $0x1c4] sm:$0xf0] }
  0x32   :  { %v1770_v21 = vor.u32 %v2142_v19, %v1769_v18  ;;  %v1817_v48 = vld [vmem:[%s3311_s1 + $0xd0] sm:$0xf]  ;;  %995 = vmatpush.bf16.msrb.mxu3 %v1962_v44  ;;  %v1729_v44 = vld [vmem:[%s3311_s1 + $0x20] sm:$0xf] }
  0x33   :  { %v89_v51 = vmul.f32 %v87_v49, %v87_v49  ;;  %v90_v52 = vmul.f32 %v88_v50, %v88_v50  ;;  %v1801_v24 = vld [vmem:[%s3311_s1 + $0xb0] sm:$0xf] }
  0x34   :  { %953 = vmatpush.bf16.msrb.mxu0 %v1770_v21  ;;  %v1802_v31 = vor.u32 %v2150_v28, %v1801_v24  ;;  %v2180_v24 = vld [vmem:[%s3311_s1 + $0x1a4] sm:$0xf0] }
  0x35   :  { %v91_v53 = vadd.f32 %v90_v52, %v89_v51  ;;  %968 = vmatpush.bf16.msrb.mxu1 %v1826_v32  ;;  %v1754_v52 = vor.u32 %v2138_v47, %v1753_v45  ;;  %v1873_v32 = vld [vmem:[%s3311_s1 + $0x140] sm:$0xf]  ;;  %v2132_v45 = vld [vmem:[%s3311_s1 + $0x24] sm:$0xf0] }
  0x37   :  { %v92_v54 = vrot.slane %v91_v53, 4 }
  0x38   :  { %954 = vmatpush.bf16.msrb.mxu0 %v1762_v30 }
  0x39   :  { %v93_v55 = vadd.f32 %v92_v54, %v91_v53  ;;  %v2154_v53 = vld [vmem:[%s3311_s1 + $0xd4] sm:$0xf0] }
  0x3a   :  { %v1818_v54 = vor.u32 %v2154_v53, %v1817_v48  ;;  %v2148_v53 = vld [vmem:[%s3311_s1 + $0xa4] sm:$0xf0] }
  0x3b   :  { %v94_v56 = vrot.slane %v93_v55, 2 }
  0x3c   :  { %955 = vmatpush.bf16.msrb.mxu0 %v1754_v52  ;;  %969 = vmatpush.bf16.msrb.mxu1 %v1818_v54  ;;  %v1793_v52 = vld [vmem:[%s3311_s1 + $0xa0] sm:$0xf] }
  0x3d   :  { %v95_v57 = vadd.f32 %v94_v56, %v93_v55  ;;  %v1889_v55 = vld [vmem:[%s3311_s1 + $0x160] sm:$0xf]  ;;  %v2172_v56 = vld [vmem:[%s3311_s1 + $0x164] sm:$0xf0] }
  0x3f   :  { %v96_v58 = vrot.slane %v95_v57, 1 }
  0x41   :  { %v97_v59 = vadd.f32 %v96_v58, %v95_v57  ;;  %v1953_v57 = vld [vmem:[%s3311_s1 + $0x1e0] sm:$0xf]  ;;  %v162_v58 = vperm.slane %v2594_v23, 3 }
  0x43   :  { %v98_v60 = vmul.f32 %v97_v59, %v2569_v46 }
  0x45   :  { %v99_v61 = vadd.f32 1e-05, %v98_v60 }
  0x47   :  { %2235 = vrsqrt.f32 %v99_v61  ;;  %vm106_vm1 = vweird.f32 %v99_v61 }
  0x4d   :  { %v2236_v62 = vpop.eup %2235 }
  0x4e   :  { %v101_v63 = vmul.f32 %v2236_v62, %v99_v61  ;;  %vm107_vm2 = vweird.f32 %v2236_v62  ;;  %v1890_v61 = vor.u32 %v2172_v56, %v1889_v55  ;;  %v1794_v56 = vor.u32 %v2148_v53, %v1793_v52 }
  0x4f   :  { %vm108_vm3 = vmor %vm106_vm1, %vm107_vm2 }
  0x50   :  { %v102_v0 = vmul.f32 %v2236_v62, %v101_v63  ;;  %982 = vmatpush.bf16.msrb.mxu2 %v1890_v61 }
  0x52   :  { %v103_v1 = vmul.f32 0.5, %v102_v0  ;;  %v1745_v0 = vld [vmem:[%s3311_s1 + $0x40] sm:$0xf] }
  0x54   :  { %v104_v2 = vsub.f32 1.5, %v103_v1  ;;  %v2136_v1 = vld [vmem:[%s3311_s1 + $0x44] sm:$0xf0] }
  0x56   :  { %v105_v3 = vmul.f32 %v2236_v62, %v104_v2  ;;  %v1809_v2 = vld [vmem:[%s3311_s1 + $0xc0] sm:$0xf] }
  0x58   :  { %v109_v5 = vsel %vm108_vm3, %v2236_v62, %v105_v3  ;;  %v2188_v62 = vld [vmem:[%s3311_s1 + $0x1e4] sm:$0xf0] }
  0x59   :  { %v110_v6 = vmul.f32 %v109_v5, %v87_v49  ;;  %v111_v7 = vmul.f32 %v109_v5, %v88_v50  ;;  %v161_v49 = vperm.slane %v2594_v23, 2  ;;  %v1954_v63 = vor.u32 %v2188_v62, %v1953_v57  ;;  %v2134_v23 = vld [vmem:[%s3311_s1 + $0x34] sm:$0xf0]  ;;  %v1865_v57 = vld [vmem:[%s3311_s1 + $0x130] sm:$0xf] }
  0x5a   :  { %v1746_v5 = vor.u32 %v2136_v1, %v1745_v0  ;;  %v1738_v27 = vor.u32 %v2134_v23, %v1737_v22 }
  0x5b   :  { %v115_v9 = vmul.f32 %v2224_v4, %v110_v6  ;;  %v116_v10 = vmul.f32 %v2224_v4, %v111_v7  ;;  %v2152_v6 = vld [vmem:[%s3311_s1 + $0xc4] sm:$0xf0]  ;;  %996 = vmatpush.bf16.msrb.mxu3 %v1954_v63  ;;  %v2182_v63 = vld [vmem:[%s3311_s1 + $0x1b4] sm:$0xf0] }
  0x5c   :  { %v1810_v7 = vor.u32 %v2152_v6, %v1809_v2  ;;  %956 = vmatpush.bf16.msrb.mxu0 %v1746_v5 }
  0x5d   :  { %v120_v11 = vadd.f32 %v2225_v8, %v115_v9  ;;  %v121_v12 = vadd.f32 %v2225_v8, %v116_v10  ;;  %v1881_v8 = vld [vmem:[%s3311_s1 + $0x150] sm:$0xf]  ;;  %v2170_v9 = vld [vmem:[%s3311_s1 + $0x154] sm:$0xf0] }
  0x5e   :  { %v1945_v10 = vld [vmem:[%s3311_s1 + $0x1d0] sm:$0xf]  ;;  %970 = vmatpush.bf16.msrb.mxu1 %v1810_v7 }
  0x5f   :  { %v122_v13 = vmax.f32 %v120_v11, 0.0  ;;  %v123_v14 = vmax.f32 %v121_v12, 0.0 }
  0x60   :  { %957 = vmatpush.bf16.msrb.mxu0 %v1738_v27 }
  0x61   :  { %v124_v15 = vpack.c.bf16 %v123_v14, %v122_v13 }
  0x62   :  { %971 = vmatpush.bf16.msrb.mxu1 %v1802_v31  ;;  %v1777_v31 = vld [vmem:[%s3311_s1 + $0x80] sm:$0xf] }
  0x63   :  { %335 = vmatmul.bf16.vlgmr.msra.gmra.mxu0 %v124_v15  ;;  %349 = vmatmul.bf16.vlgmr.msra.gmra.mxu1 %v124_v15 }
  0x64   :  { %363 = vmatmul.bf16.vlgmr.msra.gmra.mxu2 %v124_v15  ;;  %377 = vmatmul.bf16.vlgmr.msra.gmra.mxu3 %v124_v15 }
  0x66   :  { %972 = vmatpush.bf16.msrb.mxu1 %v1794_v56  ;;  %v2178_v56 = vld [vmem:[%s3311_s1 + $0x194] sm:$0xf0] }
  0xe0   :  { %v336_v16 = vpop.f32.mrf.mxu0  ;;  %v350_v17 = vpop.f32.mrf.mxu1 }
  0xe1   :  { %v2619_v36 = vadd.f32 %v336_v16, %v159_v25  ;;  %v2621_v37 = vadd.f32 %v350_v17, %v160_v26  ;;  %v1882_v16 = vor.u32 %v2170_v9, %v1881_v8  ;;  %v2186_v17 = vld [vmem:[%s3311_s1 + $0x1d4] sm:$0xf0]  ;;  %v1785_v8 = vld [vmem:[%s3311_s1 + $0x90] sm:$0xf] }
  0xe2   :  { %v1946_v21 = vor.u32 %v2186_v17, %v1945_v10  ;;  %v2146_v9 = vld [vmem:[%s3311_s1 + $0x94] sm:$0xf0] }
  0xe3   :  { %983 = vmatpush.bf16.msrb.mxu2 %v1882_v16  ;;  %v1921_v16 = vld [vmem:[%s3311_s1 + $0x1a0] sm:$0xf] }
  0xe4   :  { %997 = vmatpush.bf16.msrb.mxu3 %v1946_v21 }
  0xe7   :  { %v364_v38 = vpop.f32.mrf.mxu2  ;;  %v378_v39 = vpop.f32.mrf.mxu3 }
  0xe8   :  { %v338_v42 = vpop.f32.mrf.mxu0  ;;  %v352_v43 = vpop.f32.mrf.mxu1  ;;  %v2681_v11 = vadd.f32 %v364_v38, %v161_v49  ;;  %v2686_v18 = vadd.f32 %v378_v39, %v162_v58  ;;  %v1874_v39 = vor.u32 %v2168_v33, %v1873_v32  ;;  %v2144_v32 = vld [vmem:[%s3311_s1 + $0x84] sm:$0xf0]  ;;  %v2141_v33 = vld [vmem:[%s3311_s1 + $0x74] sm:$0xf] }
  0xe9   :  { %v2636_v50 = vadd.f32 %v338_v42, %v159_v25  ;;  %v2638_v51 = vadd.f32 %v352_v43, %v160_v26  ;;  %v1938_v43 = vor.u32 %v2184_v40, %v1937_v34  ;;  %v2157_v40 = vld [vmem:[%s3311_s1 + $0xf4] sm:$0xf] }
  0xea   :  { %984 = vmatpush.bf16.msrb.mxu2 %v1874_v39  ;;  %v1771_v39 = vld [vmem:[%s3311_s1 + $0x78] sm:$0xf0] }
  0xeb   :  { %v385_v59 = vadd.f32 %v2636_v50, %v2619_v36  ;;  %v392_v60 = vadd.f32 %v2638_v51, %v2621_v37  ;;  %998 = vmatpush.bf16.msrb.mxu3 %v1938_v43 }
  0xed   :  { %v386_v3 = vrot.slane %v385_v59, 4  ;;  %v393_v4 = vrot.slane %v392_v60, 4 }
  0xef   :  { %v387_v12 = vadd.f32 %v386_v3, %v385_v59  ;;  %v394_v13 = vadd.f32 %v393_v4, %v392_v60  ;;  %v366_v14 = vpop.f32.mrf.mxu2  ;;  %v380_v15 = vpop.f32.mrf.mxu3  ;;  %v1929_v59 = vld [vmem:[%s3311_s1 + $0x1b0] sm:$0xf]  ;;  %v2130_v4 = vld [vmem:[%s3311_s1 + $0x14] sm:$0xf0] }
  0xf0   :  { %v2688_v19 = vadd.f32 %v366_v14, %v161_v49  ;;  %v2690_v20 = vadd.f32 %v380_v15, %v162_v58  ;;  %v1730_v49 = vor.u32 %v2132_v45, %v1729_v44  ;;  %v2166_v58 = vld [vmem:[%s3311_s1 + $0x134] sm:$0xf0]  ;;  %v1930_v2 = vor.u32 %v2182_v63, %v1929_v59  ;;  %v1721_v3 = vld [vmem:[%s3311_s1 + $0x10] sm:$0xf]  ;;  %v1857_v14 = vld [vmem:[%s3311_s1 + $0x120] sm:$0xf] }
  0xf1   :  { %v388_v25 = vrot.slane %v387_v12, 2  ;;  %v395_v26 = vrot.slane %v394_v13, 2  ;;  %v1866_v62 = vor.u32 %v2166_v58, %v1865_v57  ;;  %v1722_v7 = vor.u32 %v2130_v4, %v1721_v3  ;;  %v2164_v15 = vld [vmem:[%s3311_s1 + $0x124] sm:$0xf0]  ;;  %v1827_v3 = vld [vmem:[%s3311_s1 + $0xe8] sm:$0xf0] }
  0xf2   :  { %v399_v29 = vadd.f32 %v2688_v19, %v2681_v11  ;;  %v406_v30 = vadd.f32 %v2690_v20, %v2686_v18  ;;  %958 = vmatpush.bf16.msrb.mxu0 %v1730_v49  ;;  %999 = vmatpush.bf16.msrb.mxu3 %v1930_v2  ;;  %v1858_v27 = vor.u32 %v2164_v15, %v1857_v14  ;;  %v1913_v49 = vld [vmem:[%s3311_s1 + $0x190] sm:$0xf]  ;;  %v2155_v2 = vld [vmem:[%s3311_s1 + $0xe4] sm:$0xf] }
  0xf3   :  { %v389_v35 = vadd.f32 %v388_v25, %v387_v12  ;;  %v396_v38 = vadd.f32 %v395_v26, %v394_v13  ;;  %985 = vmatpush.bf16.msrb.mxu2 %v1866_v62  ;;  %v1786_v13 = vor.u32 %v2146_v9, %v1785_v8  ;;  %v1778_v44 = vor.u32 %v2144_v32, %v1777_v31  ;;  %v2176_v9 = vld [vmem:[%s3311_s1 + $0x184] sm:$0xf0]  ;;  %v2153_v32 = vld [vmem:[%s3311_s1 + $0xd4] sm:$0xf] }
  0xf4   :  { %v400_v41 = vrot.slane %v399_v29, 4  ;;  %v407_v42 = vrot.slane %v406_v30, 4  ;;  %v1774_v45 = vor.u32 %v2141_v33, %v1771_v39  ;;  %v1914_v59 = vor.u32 %v2178_v56, %v1913_v49  ;;  %v1819_v33 = vld [vmem:[%s3311_s1 + $0xd8] sm:$0xf0] }
  0xf5   :  { %v390_v47 = vrot.slane %v389_v35, 1  ;;  %v397_v48 = vrot.slane %v396_v38, 1  ;;  %973 = vmatpush.bf16.msrb.mxu1 %v1786_v13  ;;  %v1830_v15 = vor.u32 %v2155_v2, %v1827_v3  ;;  %v1822_v39 = vor.u32 %v2153_v32, %v1819_v33  ;;  %v2169_v2 = vld [vmem:[%s3311_s1 + $0x154] sm:$0xf]  ;;  %v1883_v3 = vld [vmem:[%s3311_s1 + $0x158] sm:$0xf0] }
  0xf6   :  { %v401_v54 = vadd.f32 %v400_v41, %v399_v29  ;;  %v408_v55 = vadd.f32 %v407_v42, %v406_v30  ;;  %959 = vmatpush.bf16.msrb.mxu0 %v1722_v7  ;;  %v1835_v41 = vld [vmem:[%s3311_s1 + $0xf8] sm:$0xf0]  ;;  %v1731_v32 = vld [vmem:[%s3311_s1 + $0x28] sm:$0xf0]  ;;  %v2147_v33 = vld [vmem:[%s3311_s1 + $0xa4] sm:$0xf] }
  0xf7   :  { %v391_v60 = vadd.f32 %v390_v47, %v389_v35  ;;  %v398_v61 = vadd.f32 %v397_v48, %v396_v38  ;;  %986 = vmatpush.bf16.msrb.mxu2 %v1858_v27  ;;  %v1849_v47 = vld [vmem:[%s3311_s1 + $0x110] sm:$0xf]  ;;  %v2162_v48 = vld [vmem:[%s3311_s1 + $0x114] sm:$0xf0] }
  0xf8   :  { %v402_v0 = vrot.slane %v401_v54, 2  ;;  %v409_v1 = vrot.slane %v408_v55, 2 }
  0xf9   :  { %v413_v5 = vmul.f32 %v391_v60, %v2569_v46  ;;  %v414_v6 = vmul.f32 %v398_v61, %v2569_v46  ;;  %974 = vmatpush.bf16.msrb.mxu1 %v1778_v44  ;;  %v2139_v60 = vld [vmem:[%s3311_s1 + $0x64] sm:$0xf]  ;;  %v1763_v61 = vld [vmem:[%s3311_s1 + $0x68] sm:$0xf0] }
  0xfa   :  { %v403_v10 = vadd.f32 %v402_v0, %v401_v54  ;;  %v410_v12 = vadd.f32 %v409_v1, %v408_v55  ;;  %v1838_v54 = vor.u32 %v2157_v40, %v1835_v41  ;;  %v1850_v55 = vor.u32 %v2162_v48, %v1849_v47  ;;  %v1891_v40 = vld [vmem:[%s3311_s1 + $0x168] sm:$0xf0]  ;;  %v2187_v41 = vld [vmem:[%s3311_s1 + $0x1e4] sm:$0xf] }
  0xfb   :  { %v2768_v17 = vsub.f32 %v2619_v36, %v413_v5  ;;  %v2771_v21 = vsub.f32 %v2636_v50, %v413_v5  ;;  %v2774_v22 = vsub.f32 %v2621_v37, %v414_v6  ;;  %v2777_v23 = vsub.f32 %v2638_v51, %v414_v6  ;;  %v1713_v50 = vld [vmem:[%s3311_s1] sm:$0xf]  ;;  %v2128_v37 = vld [vmem:[%s3311_s1 + $0x4] sm:$0xf0]  ;;  %v1955_v47 = vld [vmem:[%s3311_s1 + $0x1e8] sm:$0xf0] }
  0xfc   :  { %v404_v25 = vrot.slane %v403_v10, 1  ;;  %v411_v26 = vrot.slane %v410_v12, 1  ;;  %v1922_v36 = vor.u32 %v2180_v24, %v1921_v16  ;;  %v1714_v38 = vor.u32 %v2128_v37, %v1713_v50  ;;  %987 = vmatpush.bf16.msrb.mxu2 %v1850_v55  ;;  %v1905_v5 = vld [vmem:[%s3311_s1 + $0x180] sm:$0xf]  ;;  %v1899_v16 = vld [vmem:[%s3311_s1 + $0x178] sm:$0xf0] }
  0xfd   :  { %v425_v51 = vmul.f32 %v2768_v17, %v2768_v17  ;;  %v429_v28 = vmul.f32 %v2771_v21, %v2771_v21  ;;  %v426_v29 = vmul.f32 %v2774_v22, %v2774_v22  ;;  %v430_v30 = vmul.f32 %v2777_v23, %v2777_v23  ;;  %1023 = vmatpush.bf16.msra.mxu1 %v1838_v54  ;;  %v2189_v24 = vld [vmem:[%s3311_s1 + $0x1f4] sm:$0xf]  ;;  %v1963_v50 = vld [vmem:[%s3311_s1 + $0x1f8] sm:$0xf0] }
  0xfe   :  { %v405_v34 = vadd.f32 %v404_v25, %v403_v10  ;;  %v412_v35 = vadd.f32 %v411_v26, %v410_v12  ;;  %1000 = vmatpush.bf16.msrb.mxu3 %v1922_v36  ;;  %960 = vmatpush.bf16.msrb.mxu0 %v1714_v38  ;;  %v2173_v10 = vld [vmem:[%s3311_s1 + $0x174] sm:$0xf]  ;;  %v1906_v27 = vor.u32 %v2176_v9, %v1905_v5  ;;  %v1947_v5 = vld [vmem:[%s3311_s1 + $0x1d8] sm:$0xf0] }
  0xff   :  { %v433_v42 = vadd.f32 %v429_v28, %v425_v51  ;;  %v440_v43 = vadd.f32 %v430_v30, %v426_v29  ;;  %v1902_v36 = vor.u32 %v2173_v10, %v1899_v16  ;;  %v2137_v37 = vld [vmem:[%s3311_s1 + $0x54] sm:$0xf]  ;;  %v1755_v51 = vld [vmem:[%s3311_s1 + $0x58] sm:$0xf0]  ;;  %v1966_v31 = vor.u32 %v2189_v24, %v1963_v50 }
 0x100   :  { %v415_v52 = vmul.f32 %v405_v34, %v2569_v46  ;;  %v416_v53 = vmul.f32 %v412_v35, %v2569_v46  ;;  %v2171_v34 = vld [vmem:[%s3311_s1 + $0x164] sm:$0xf]  ;;  %v1758_v38 = vor.u32 %v2137_v37, %v1755_v51  ;;  %v1958_v49 = vor.u32 %v2187_v41, %v1955_v47  ;;  %v1739_v9 = vld [vmem:[%s3311_s1 + $0x38] sm:$0xf0]  ;;  %v2149_v16 = vld [vmem:[%s3311_s1 + $0xb4] sm:$0xf] }
 0x101   :  { %v434_v57 = vrot.slane %v433_v42, 4  ;;  %v441_v58 = vrot.slane %v440_v43, 4  ;;  %1024 = vmatpush.bf16.msra.mxu1 %v1830_v15  ;;  %v1803_v24 = vld [vmem:[%s3311_s1 + $0xb8] sm:$0xf0]  ;;  %v2183_v51 = vld [vmem:[%s3311_s1 + $0x1c4] sm:$0xf] }
 0x102   :  { %1009 = vmatpush.bf16.msra.mxu0 %v1774_v45  ;;  %v2835_v62 = vsub.f32 %v2681_v11, %v415_v52  ;;  %v2838_v63 = vsub.f32 %v2688_v19, %v415_v52  ;;  %v2841_v0 = vsub.f32 %v2686_v18, %v416_v53  ;;  %v2844_v1 = vsub.f32 %v2690_v20, %v416_v53  ;;  %v1841_v18 = vld [vmem:[%s3311_s1 + $0x100] sm:$0xf]  ;;  %v2160_v20 = vld [vmem:[%s3311_s1 + $0x104] sm:$0xf0]  ;;  %v2135_v52 = vld [vmem:[%s3311_s1 + $0x44] sm:$0xf] }
 0x103   :  { %v435_v11 = vadd.f32 %v434_v57, %v433_v42  ;;  %v442_v4 = vadd.f32 %v441_v58, %v440_v43  ;;  %1001 = vmatpush.bf16.msrb.mxu3 %v1914_v59  ;;  %v1766_v19 = vor.u32 %v2139_v60, %v1763_v61  ;;  %v1842_v26 = vor.u32 %v2160_v20, %v1841_v18  ;;  %v1747_v53 = vld [vmem:[%s3311_s1 + $0x48] sm:$0xf0]  ;;  %v2151_v57 = vld [vmem:[%s3311_s1 + $0xc4] sm:$0xf]  ;;  %v2185_v20 = vld [vmem:[%s3311_s1 + $0x1d4] sm:$0xf] }
 0x104   :  { %v427_v6 = vmul.f32 %v2835_v62, %v2835_v62  ;;  %v431_v7 = vmul.f32 %v2838_v63, %v2838_v63  ;;  %v428_v8 = vmul.f32 %v2841_v0, %v2841_v0  ;;  %v432_v14 = vmul.f32 %v2844_v1, %v2844_v1  ;;  %v1811_v58 = vld [vmem:[%s3311_s1 + $0xc8] sm:$0xf0]  ;;  %v1867_v41 = vld [vmem:[%s3311_s1 + $0x138] sm:$0xf0] }
 0x105   :  { %v436_v12 = vrot.slane %v435_v11, 2  ;;  %v443_v13 = vrot.slane %v442_v4, 2  ;;  %988 = vmatpush.bf16.msrb.mxu2 %v1842_v26  ;;  %v1894_v45 = vor.u32 %v2171_v34, %v1891_v40  ;;  %1025 = vmatpush.bf16.msra.mxu1 %v1822_v39  ;;  %v1750_v60 = vor.u32 %v2135_v52, %v1747_v53  ;;  %v2167_v26 = vld [vmem:[%s3311_s1 + $0x144] sm:$0xf]  ;;  %v1795_v34 = vld [vmem:[%s3311_s1 + $0xa8] sm:$0xf0] }
 0x106   :  { %1010 = vmatpush.bf16.msra.mxu0 %v1766_v19  ;;  %v447_v25 = vadd.f32 %v431_v7, %v427_v6  ;;  %v454_v30 = vadd.f32 %v432_v14, %v428_v8  ;;  %v1814_v61 = vor.u32 %v2151_v57, %v1811_v58  ;;  %v1886_v18 = vor.u32 %v2169_v2, %v1883_v3  ;;  %v2133_v8 = vld [vmem:[%s3311_s1 + $0x34] sm:$0xf]  ;;  %v1723_v52 = vld [vmem:[%s3311_s1 + $0x18] sm:$0xf0]  ;;  %v2179_v2 = vld [vmem:[%s3311_s1 + $0x1a4] sm:$0xf] }
 0x107   :  { %v437_v28 = vadd.f32 %v436_v12, %v435_v11  ;;  %v444_v29 = vadd.f32 %v443_v13, %v442_v4  ;;  %1002 = vmatpush.bf16.msrb.mxu3 %v1906_v27  ;;  %v1950_v7 = vor.u32 %v2185_v20, %v1947_v5  ;;  %v1742_v15 = vor.u32 %v2133_v8, %v1739_v9  ;;  %v1875_v27 = vld [vmem:[%s3311_s1 + $0x148] sm:$0xf0]  ;;  %v2165_v40 = vld [vmem:[%s3311_s1 + $0x134] sm:$0xf]  ;;  %v1787_v57 = vld [vmem:[%s3311_s1 + $0x98] sm:$0xf0] }
 0x108   :  { %v448_v35 = vrot.slane %v447_v25, 4  ;;  %v455_v44 = vrot.slane %v454_v30, 4  ;;  %v1806_v50 = vor.u32 %v2149_v16, %v1803_v24  ;;  %v1878_v37 = vor.u32 %v2167_v26, %v1875_v27  ;;  %v2143_v8 = vld [vmem:[%s3311_s1 + $0x84] sm:$0xf]  ;;  %v1851_v16 = vld [vmem:[%s3311_s1 + $0x118] sm:$0xf0] }
 0x109   :  { %v438_v42 = vrot.slane %v437_v28, 1  ;;  %v445_v43 = vrot.slane %v444_v29, 1  ;;  %1037 = vmatpush.bf16.msra.mxu2 %v1902_v36  ;;  %1026 = vmatpush.bf16.msra.mxu1 %v1814_v61  ;;  %v1798_v39 = vor.u32 %v2147_v33, %v1795_v34  ;;  %v1859_v61 = vld [vmem:[%s3311_s1 + $0x128] sm:$0xf0]  ;;  %v2177_v26 = vld [vmem:[%s3311_s1 + $0x194] sm:$0xf] }
 0x10a   :  { %v449_v48 = vadd.f32 %v448_v35, %v447_v25  ;;  %1011 = vmatpush.bf16.msra.mxu0 %v1758_v38  ;;  %v456_v56 = vadd.f32 %v455_v44, %v454_v30  ;;  %v2181_v44 = vld [vmem:[%s3311_s1 + $0x1b4] sm:$0xf]  ;;  %v1915_v27 = vld [vmem:[%s3311_s1 + $0x198] sm:$0xf0] }
 0x10b   :  { %1051 = vmatpush.bf16.msra.mxu3 %v1966_v31  ;;  %v439_v54 = vadd.f32 %v438_v42, %v437_v28  ;;  %v446_v55 = vadd.f32 %v445_v43, %v444_v29  ;;  %v1939_v28 = vld [vmem:[%s3311_s1 + $0x1c8] sm:$0xf0]  ;;  %v2131_v29 = vld [vmem:[%s3311_s1 + $0x24] sm:$0xf]  ;;  %v1870_v43 = vor.u32 %v2165_v40, %v1867_v41 }
 0x10c   :  { %v450_v59 = vrot.slane %v449_v48, 2  ;;  %v457_v19 = vrot.slane %v456_v56, 2  ;;  %v1942_v31 = vor.u32 %v2183_v51, %v1939_v28  ;;  %v1734_v38 = vor.u32 %v2131_v29, %v1731_v32  ;;  %v3066_v32 = vld [vmem:[%s3283_s6] sm:$0xf]  ;;  %v1843_v40 = vld [vmem:[%s3311_s1 + $0x108] sm:$0xf0] }
 0x10d   :  { %v461_v11 = vmul.f32 %v439_v54, %v2569_v46  ;;  %v462_v4 = vmul.f32 %v446_v55, %v2569_v46  ;;  %1038 = vmatpush.bf16.msra.mxu2 %v1894_v45  ;;  %1027 = vmatpush.bf16.msra.mxu1 %v1806_v50  ;;  %v1931_v45 = vld [vmem:[%s3311_s1 + $0x1b8] sm:$0xf0]  ;;  %v1918_v51 = vor.u32 %v2177_v26, %v1915_v27 }
 0x10e   :  { %v451_v6 = vadd.f32 %v450_v59, %v449_v48  ;;  %1012 = vmatpush.bf16.msra.mxu0 %v1750_v60  ;;  %v458_v13 = vadd.f32 %v457_v19, %v456_v56  ;;  %v1934_v48 = vor.u32 %v2181_v44, %v1931_v45  ;;  %v2145_v56 = vld [vmem:[%s3311_s1 + $0x94] sm:$0xf]  ;;  %v2163_v60 = vld [vmem:[%s3311_s1 + $0x124] sm:$0xf]  ;;  %v3034_v19 = vld [vmem:[%s3282_s5] sm:$0xf] }
 0x10f   :  { %1052 = vmatpush.bf16.msra.mxu3 %v1958_v49  ;;  %v2940_v10 = vadd.f32 1e-05, %v461_v11  ;;  %v2942_v12 = vadd.f32 1e-05, %v462_v4  ;;  %v2129_v49 = vld [vmem:[%s3311_s1 + $0x14] sm:$0xf]  ;;  %v1790_v20 = vor.u32 %v2145_v56, %v1787_v57  ;;  %v1862_v5 = vor.u32 %v2163_v60, %v1859_v61 }
 0x110   :  { %v452_v14 = vrot.slane %v451_v6, 1  ;;  %v459_v25 = vrot.slane %v458_v13, 1  ;;  %v1726_v55 = vor.u32 %v2129_v49, %v1723_v52  ;;  %v1923_v11 = vld [vmem:[%s3311_s1 + $0x1a8] sm:$0xf0]  ;;  %v2127_v4 = vld [vmem:[%s3311_s1 + $0x4] sm:$0xf] }
 0x111   :  { %2237 = vrsqrt.f32 %v2940_v10  ;;  %1039 = vmatpush.bf16.msra.mxu2 %v1886_v18  ;;  %1028 = vmatpush.bf16.msra.mxu1 %v1798_v39  ;;  %v2159_v39 = vld [vmem:[%s3311_s1 + $0x104] sm:$0xf]  ;;  %vm475_vm6 = vweird.f32 %v2940_v10  ;;  %v1907_v45 = vld [vmem:[%s3311_s1 + $0x188] sm:$0xf0]  ;;  %vm485_vm8 = vweird.f32 %v2942_v12  ;;  %v535_v56 = vperm.slane %v3066_v32, 0 }
 0x112   :  { %2239 = vrsqrt.f32 %v2942_v12  ;;  %v453_v36 = vadd.f32 %v452_v14, %v451_v6  ;;  %1013 = vmatpush.bf16.msra.mxu0 %v1742_v15  ;;  %v460_v30 = vadd.f32 %v459_v25, %v458_v13  ;;  %v1926_v6 = vor.u32 %v2179_v2, %v1923_v11  ;;  %v1779_v14 = vld [vmem:[%s3311_s1 + $0x88] sm:$0xf0]  ;;  %v2161_v15 = vld [vmem:[%s3311_s1 + $0x114] sm:$0xf]  ;;  %v2175_v44 = vld [vmem:[%s3311_s1 + $0x184] sm:$0xf] }
 0x113   :  { %1053 = vmatpush.bf16.msra.mxu3 %v1950_v7  ;;  %v1715_v7 = vld [vmem:[%s3311_s1 + $0x8] sm:$0xf0]  ;;  %v1782_v25 = vor.u32 %v2143_v8, %v1779_v14  ;;  %v1910_v49 = vor.u32 %v2175_v44, %v1907_v45  ;;  %v536_v57 = vperm.slane %v3066_v32, 1  ;;  %v537_v11 = vperm.slane %v3066_v32, 2 }
 0x114   :  { %v463_v35 = vmul.f32 %v453_v36, %v2569_v46  ;;  %v464_v42 = vmul.f32 %v460_v30, %v2569_v46  ;;  %v1718_v13 = vor.u32 %v2127_v4, %v1715_v7  ;;  %v518_v36 = vperm.slane %v3034_v19, 0 }
 0x115   :  { %1040 = vmatpush.bf16.msra.mxu2 %v1878_v37  ;;  %1029 = vmatpush.bf16.msra.mxu1 %v1790_v20  ;;  %v1854_v37 = vor.u32 %v2161_v15, %v1851_v16  ;;  %v519_v30 = vperm.slane %v3034_v19, 1  ;;  %v538_v15 = vperm.slane %v3066_v32, 3 }
 0x116   :  { %v2990_v47 = vadd.f32 1e-05, %v463_v35  ;;  %1014 = vmatpush.bf16.msra.mxu0 %v1734_v38  ;;  %v3000_v54 = vadd.f32 1e-05, %v464_v42  ;;  %v521_v38 = vperm.slane %v3034_v19, 3 }
 0x117   :  { %1054 = vmatpush.bf16.msra.mxu3 %v1942_v31  ;;  %v2998_v53 = vpop.eup %2237  ;;  %v520_v31 = vperm.slane %v3034_v19, 2 }
 0x118   :  { %v3008_v58 = vpop.eup %2239  ;;  %v470_v59 = vmul.f32 %v2998_v53, %v2940_v10  ;;  %2241 = vrsqrt.f32 %v2990_v47  ;;  %vm476_vm4 = vweird.f32 %v2998_v53  ;;  %vm495_vm12 = vweird.f32 %v2990_v47 }
 0x119   :  { %v480_v3 = vmul.f32 %v3008_v58, %v2942_v12  ;;  %2243 = vrsqrt.f32 %v3000_v54  ;;  %1041 = vmatpush.bf16.msra.mxu2 %v1870_v43  ;;  %vm486_vm5 = vweird.f32 %v3008_v58  ;;  %1030 = vmatpush.bf16.msra.mxu1 %v1782_v25  ;;  %v1846_v43 = vor.u32 %v2159_v39, %v1843_v40  ;;  %vm477_vm7 = vmor %vm475_vm6, %vm476_vm4 }
 0x11a   :  { %v471_v18 = vmul.f32 %v2998_v53, %v470_v59  ;;  %1015 = vmatpush.bf16.msra.mxu0 %v1726_v55  ;;  %vm487_vm9 = vmor %vm485_vm8, %vm486_vm5  ;;  %vm505_vm14 = vweird.f32 %v3000_v54 }
 0x11b   :  { %1055 = vmatpush.bf16.msra.mxu3 %v1934_v48  ;;  %v481_v9 = vmul.f32 %v3008_v58, %v480_v3 }
 0x11c   :  { %v472_v24 = vmul.f32 0.5, %v471_v18 }
 0x11d   :  { %v482_v50 = vmul.f32 0.5, %v481_v9  ;;  %1042 = vmatpush.bf16.msra.mxu2 %v1862_v5 }
 0x11e   :  { %v2242_v28 = vpop.eup %2241  ;;  %v473_v29 = vsub.f32 1.5, %v472_v24  ;;  %1016 = vmatpush.bf16.msra.mxu0 %v1718_v13 }
 0x11f   :  { %1056 = vmatpush.bf16.msra.mxu3 %v1926_v6  ;;  %v2244_v33 = vpop.eup %2243  ;;  %v483_v34 = vsub.f32 1.5, %v482_v50  ;;  %v490_v35 = vmul.f32 %v2242_v28, %v2990_v47  ;;  %vm496_vm10 = vweird.f32 %v2242_v28 }
 0x120   :  { %v474_v41 = vmul.f32 %v2998_v53, %v473_v29  ;;  %v500_v42 = vmul.f32 %v2244_v33, %v3000_v54  ;;  %vm506_vm11 = vweird.f32 %v2244_v33  ;;  %vm497_vm13 = vmor %vm495_vm12, %vm496_vm10 }
 0x121   :  { %v484_v48 = vmul.f32 %v3008_v58, %v483_v34  ;;  %v491_v10 = vmul.f32 %v2242_v28, %v490_v35  ;;  %1043 = vmatpush.bf16.msra.mxu2 %v1854_v37  ;;  %vm507_vm15 = vmor %vm505_vm14, %vm506_vm11 }
 0x122   :  { %v478_v52 = vsel %vm477_vm7, %v2998_v53, %v474_v41  ;;  %v501_v55 = vmul.f32 %v2244_v33, %v500_v42 }
 0x123   :  { %1057 = vmatpush.bf16.msra.mxu3 %v1918_v51  ;;  %v509_v59 = vmul.f32 %v478_v52, %v2768_v17  ;;  %v513_v60 = vmul.f32 %v478_v52, %v2771_v21  ;;  %v488_v12 = vsel %vm487_vm9, %v3008_v58, %v484_v48  ;;  %v492_v61 = vmul.f32 0.5, %v491_v10 }
 0x124   :  { %v510_v2 = vmul.f32 %v488_v12, %v2774_v22  ;;  %v514_v3 = vmul.f32 %v488_v12, %v2777_v23  ;;  %v502_v53 = vmul.f32 0.5, %v501_v55 }
 0x125   :  { %v530_v4 = vmul.f32 %v518_v36, %v513_v60  ;;  %v493_v18 = vsub.f32 1.5, %v492_v61  ;;  %v526_v20 = vmul.f32 %v518_v36, %v509_v59  ;;  %1044 = vmatpush.bf16.msra.mxu2 %v1846_v43 }
 0x126   :  { %v531_v5 = vmul.f32 %v519_v30, %v514_v3  ;;  %v503_v17 = vsub.f32 1.5, %v502_v53  ;;  %v527_v21 = vmul.f32 %v519_v30, %v510_v2 }
 0x127   :  { %1058 = vmatpush.bf16.msra.mxu3 %v1910_v49  ;;  %v494_v6 = vmul.f32 %v2242_v28, %v493_v18  ;;  %v543_v58 = vadd.f32 %v535_v56, %v526_v20  ;;  %v547_v22 = vadd.f32 %v535_v56, %v530_v4 }
 0x128   :  { %v504_v23 = vmul.f32 %v2244_v33, %v503_v17  ;;  %v544_v7 = vadd.f32 %v536_v57, %v527_v21  ;;  %v548_v8 = vadd.f32 %v536_v57, %v531_v5 }
 0x129   :  { %v498_v9 = vsel %vm497_vm13, %v2242_v28, %v494_v6  ;;  %v551_v13 = vmax.f32 %v543_v58, 0.0  ;;  %v555_v14 = vmax.f32 %v547_v22, 0.0  ;;  %v2197_v58 = vld [vmem:[%s3286_s11 + $0x30] sm:$0xff] }
 0x12a   :  { %v511_v16 = vmul.f32 %v498_v9, %v2835_v62  ;;  %v515_v24 = vmul.f32 %v498_v9, %v2838_v63  ;;  %v508_v25 = vsel %vm507_vm15, %v2244_v33, %v504_v23  ;;  %v552_v47 = vmax.f32 %v544_v7, 0.0 }
 0x12b   :  { %v512_v26 = vmul.f32 %v508_v25, %v2841_v0  ;;  %v516_v27 = vmul.f32 %v508_v25, %v2844_v1  ;;  %v559_v36 = vpack.c.bf16 %v555_v14, %v551_v13  ;;  %v556_v54 = vmax.f32 %v548_v8, 0.0  ;;  %v2196_v14 = vld [vmem:[%s3286_s11 + $0x28] sm:$0xff] }
 0x12c   :  { %v532_v50 = vmul.f32 %v520_v31, %v515_v24  ;;  %v528_v37 = vmul.f32 %v520_v31, %v511_v16 }
 0x12d   :  { %v533_v51 = vmul.f32 %v521_v38, %v516_v27  ;;  %961 = vmatmul.bf16.vlgmr.msrb.gmra.mxu0 %v559_v36  ;;  %v560_v62 = vpack.c.bf16 %v556_v54, %v552_v47  ;;  %v529_v63 = vmul.f32 %v521_v38, %v512_v26  ;;  %v627_v38 = vld [vmem:[%s3285_s8] sm:$0x3] }
 0x12e   :  { %v545_v28 = vadd.f32 %v537_v11, %v528_v37  ;;  %v549_v0 = vadd.f32 %v537_v11, %v532_v50  ;;  %v629_v41 = vperm.slane %v627_v38, 0  ;;  %v630_v2 = vperm.slane %v627_v38, 1  ;;  %v2198_v11 = vld [vmem:[%s3286_s11 + $0x38] sm:$0xff]  ;;  %v2192_v38 = vld [vmem:[%s3286_s11 + $0x8] sm:$0xff] }
 0x12f   :  { %975 = vmatmul.bf16.vlgmr.msrb.gmra.mxu1 %v560_v62  ;;  %v546_v1 = vadd.f32 %v538_v15, %v529_v63  ;;  %v550_v29 = vadd.f32 %v538_v15, %v533_v51  ;;  %1289 = vmatpush.bf16.msrb.mxu0 %v2198_v11  ;;  %v2200_v11 = vld [vmem:[%s3286_s11 + $0x48] sm:$0xff] }
 0x130   :  { %v553_v30 = vmax.f32 %v545_v28, 0.0  ;;  %v557_v32 = vmax.f32 %v549_v0, 0.0  ;;  %v2194_v28 = vld [vmem:[%s3286_s11 + $0x18] sm:$0xff] }
 0x131   :  { %v554_v33 = vmax.f32 %v546_v1, 0.0  ;;  %v558_v34 = vmax.f32 %v550_v29, 0.0  ;;  %v2206_v0 = vld [vmem:[%s3286_s11 + $0x78] sm:$0xff] }
 0x132   :  { %v561_v35 = vpack.c.bf16 %v557_v32, %v553_v30  ;;  %1303 = vmatpush.bf16.msrb.mxu1 %v2206_v0 }
 0x133   :  { %v562_v39 = vpack.c.bf16 %v558_v34, %v554_v33  ;;  %1290 = vmatpush.bf16.msrb.mxu0 %v2197_v58  ;;  %v2193_v33 = vld [vmem:[%s3286_s11 + $0x10] sm:$0xff] }
 0x134   :  { %989 = vmatmul.bf16.vlgmr.msrb.gmra.mxu2 %v561_v35  ;;  %v2205_v34 = vld [vmem:[%s3286_s11 + $0x70] sm:$0xff] }
 0x135   :  { %1003 = vmatmul.bf16.vlgmr.msrb.gmra.mxu3 %v562_v39 }
 0x136   :  { %1304 = vmatpush.bf16.msrb.mxu1 %v2205_v34 }
 0x137   :  { %1291 = vmatpush.bf16.msrb.mxu0 %v2196_v14 }
 0x13d   :  { %1017 = vmatmul.bf16.vlgmr.msra.gmra.mxu0 %v559_v36  ;;  %v2195_v36 = vld [vmem:[%s3286_s11 + $0x20] sm:$0xff] }
 0x13e   :  { %1292 = vmatpush.bf16.msrb.mxu0 %v2195_v36 }
 0x13f   :  { %1031 = vmatmul.bf16.vlgmr.msra.gmra.mxu1 %v560_v62 }
 0x142   :  { %1293 = vmatpush.bf16.msrb.mxu0 %v2194_v28 }
 0x144   :  { %1045 = vmatmul.bf16.vlgmr.msra.gmra.mxu2 %v561_v35 }
 0x145   :  { %1059 = vmatmul.bf16.vlgmr.msra.gmra.mxu3 %v562_v39 }
 0x146   :  { %1294 = vmatpush.bf16.msrb.mxu0 %v2193_v33 }
 0x14a   :  { %1295 = vmatpush.bf16.msrb.mxu0 %v2192_v38 }
 0x1aa   :  { %v962_v31 = vpop.f32.mrf.mxu0 }
 0x1ab   :  { %v963_v43 = vadd.f32 %v962_v31, %v629_v41 }
 0x1ac   :  { %v976_v19 = vpop.f32.mrf.mxu1 }
 0x1ad   :  { %v977_v10 = vadd.f32 %v976_v19, %v963_v43 }
 0x1b2   :  { %v964_v40 = vpop.f32.mrf.mxu0 }
 0x1b3   :  { %v965_v48 = vadd.f32 %v964_v40, %v629_v41  ;;  %v2204_v40 = vld [vmem:[%s3286_s11 + $0x68] sm:$0xff] }
 0x1b4   :  { %v978_v45 = vpop.f32.mrf.mxu1  ;;  %1305 = vmatpush.bf16.msrb.mxu1 %v2204_v40 }
 0x1b5   :  { %v979_v52 = vadd.f32 %v978_v45, %v965_v48  ;;  %v2191_v45 = vld [vmem:[%s3286_s11] sm:$0xff] }
 0x1b6   :  { %v2203_v48 = vld [vmem:[%s3286_s11 + $0x60] sm:$0xff]  ;;  %1296 = vmatpush.bf16.msrb.mxu0 %v2191_v45 }
 0x1b7   :  { %v990_v42 = vpop.f32.mrf.mxu2 }
 0x1b8   :  { %v1004_v44 = vpop.f32.mrf.mxu3  ;;  %v991_v55 = vadd.f32 %v990_v42, %v977_v10  ;;  %1306 = vmatpush.bf16.msrb.mxu1 %v2203_v48 }
 0x1ba   :  { %v1018_v49 = vpop.f32.mrf.mxu0  ;;  %v1005_v60 = vadd.f32 %v1004_v44, %v991_v55 }
 0x1bb   :  { %v1019_v20 = vadd.f32 %v1018_v49, %v630_v2 }
 0x1bc   :  { %v1032_v61 = vpop.f32.mrf.mxu1 }
 0x1bd   :  { %v1033_v22 = vadd.f32 %v1032_v61, %v1019_v20 }
 0x1bf   :  { %v992_v56 = vpop.f32.mrf.mxu2 }
 0x1c0   :  { %v993_v57 = vadd.f32 %v992_v56, %v979_v52  ;;  %v1006_v59 = vpop.f32.mrf.mxu3 }
 0x1c2   :  { %v1007_v12 = vadd.f32 %v1006_v59, %v993_v57  ;;  %v1020_v4 = vpop.f32.mrf.mxu0  ;;  %v2202_v59 = vld [vmem:[%s3286_s11 + $0x58] sm:$0xff] }
 0x1c3   :  { %v1021_v6 = vadd.f32 %v1020_v4, %v630_v2  ;;  %1307 = vmatpush.bf16.msrb.mxu1 %v2202_v59  ;;  %v2201_v2 = vld [vmem:[%s3286_s11 + $0x50] sm:$0xff]  ;;  %v2214_v59 = vld [vmem:[%s3292_s15 + $0x38] sm:$0xff] }
 0x1c4   :  { %v1067_v3 = vadd.f32 %v1007_v12, %v1005_v60  ;;  %v1034_v7 = vpop.f32.mrf.mxu1  ;;  %1433 = vmatpush.bf16.msrb.mxu2 %v2214_v59 }
 0x1c5   :  { %v1035_v9 = vadd.f32 %v1034_v7, %v1021_v6 }
 0x1c6   :  { %v1068_v53 = vrot.slane %v1067_v3, 4 }
 0x1c7   :  { %v1046_v18 = vpop.f32.mrf.mxu2  ;;  %1308 = vmatpush.bf16.msrb.mxu1 %v2201_v2 }
 0x1c8   :  { %v1069_v5 = vadd.f32 %v1068_v53, %v1067_v3  ;;  %v1060_v17 = vpop.f32.mrf.mxu3  ;;  %v1047_v13 = vadd.f32 %v1046_v18, %v1033_v22 }
 0x1ca   :  { %v1070_v21 = vrot.slane %v1069_v5, 2  ;;  %v1061_v26 = vadd.f32 %v1060_v17, %v1047_v13  ;;  %v2199_v17 = vld [vmem:[%s3286_s11 + $0x40] sm:$0xff] }
 0x1cb   :  { %1309 = vmatpush.bf16.msrb.mxu1 %v2200_v11 }
 0x1cc   :  { %v1071_v23 = vadd.f32 %v1070_v21, %v1069_v5 }
 0x1ce   :  { %v1072_v8 = vrot.slane %v1071_v23, 1 }
 0x1cf   :  { %v1048_v15 = vpop.f32.mrf.mxu2  ;;  %1310 = vmatpush.bf16.msrb.mxu1 %v2199_v17 }
 0x1d0   :  { %v1073_v16 = vadd.f32 %v1072_v8, %v1071_v23  ;;  %v1049_v24 = vadd.f32 %v1048_v15, %v1035_v9  ;;  %v1062_v25 = vpop.f32.mrf.mxu3  ;;  %v1065_v23 = vld [vmem:[%s3287_s9] sm:$0x3] }
 0x1d1   :  { %v1066_v9 = vld [vmem:[%s3288_s10] sm:$0x3]  ;;  %v1134_v14 = vperm.slane %v1065_v23, 0 }
 0x1d2   :  { %v1081_v47 = vmul.f32 %v1073_v16, %v2569_v46  ;;  %v1063_v27 = vadd.f32 %v1062_v25, %v1049_v24  ;;  %v1143_v25 = vperm.slane %v1066_v9, 0  ;;  %v1144_v34 = vperm.slane %v1066_v9, 1  ;;  %v2208_v9 = vld [vmem:[%s3292_s15 + $0x8] sm:$0xff] }
 0x1d4   :  { %v3132_v54 = vsub.f32 %v1005_v60, %v1081_v47  ;;  %v3134_v50 = vsub.f32 %v1007_v12, %v1081_v47  ;;  %v1074_v37 = vadd.f32 %v1063_v27, %v1061_v26 }
 0x1d6   :  { %v1087_v51 = vmul.f32 %v3132_v54, %v3132_v54  ;;  %v1089_v62 = vmul.f32 %v3134_v50, %v3134_v50  ;;  %v1075_v63 = vrot.slane %v1074_v37, 4 }
 0x1d8   :  { %v1091_v1 = vadd.f32 %v1089_v62, %v1087_v51  ;;  %v1076_v29 = vadd.f32 %v1075_v63, %v1074_v37 }
 0x1da   :  { %v1092_v30 = vrot.slane %v1091_v1, 4  ;;  %v1077_v32 = vrot.slane %v1076_v29, 2 }
 0x1dc   :  { %v1093_v35 = vadd.f32 %v1092_v30, %v1091_v1  ;;  %v1078_v39 = vadd.f32 %v1077_v32, %v1076_v29 }
 0x1de   :  { %v1094_v31 = vrot.slane %v1093_v35, 2  ;;  %v1079_v19 = vrot.slane %v1078_v39, 1 }
 0x1e0   :  { %v1095_v41 = vadd.f32 %v1094_v31, %v1093_v35  ;;  %v1080_v42 = vadd.f32 %v1079_v19, %v1078_v39 }
 0x1e2   :  { %v1096_v43 = vrot.slane %v1095_v41, 1  ;;  %v1082_v44 = vmul.f32 %v1080_v42, %v2569_v46 }
 0x1e4   :  { %v1097_v10 = vadd.f32 %v1096_v43, %v1095_v41  ;;  %v3165_v49 = vsub.f32 %v1061_v26, %v1082_v44  ;;  %v3167_v52 = vsub.f32 %v1063_v27, %v1082_v44  ;;  %v2226_v44 = vld [vmem:[%s3284_s12] ss:$0 sm:$0xff] }
 0x1e6   :  { %v1105_v55 = vmul.f32 %v1097_v10, %v2569_v46  ;;  %v1088_v56 = vmul.f32 %v3165_v49, %v3165_v49  ;;  %v1090_v57 = vmul.f32 %v3167_v52, %v3167_v52 }
 0x1e8   :  { %v1107_v60 = vadd.f32 1e-05, %v1105_v55  ;;  %v1098_v12 = vadd.f32 %v1090_v57, %v1088_v56 }
 0x1ea   :  { %2245 = vrsqrt.f32 %v1107_v60  ;;  %v1099_v61 = vrot.slane %v1098_v12, 4  ;;  %vm1115_vm1 = vweird.f32 %v1107_v60 }
 0x1ec   :  { %v1100_v3 = vadd.f32 %v1099_v61, %v1098_v12  ;;  %v2213_v61 = vld [vmem:[%s3292_s15 + $0x30] sm:$0xff] }
 0x1ed   :  { %1434 = vmatpush.bf16.msrb.mxu2 %v2213_v61  ;;  %v2218_v61 = vld [vmem:[%s3296_s19 + $0x18] sm:$0xff] }
 0x1ee   :  { %v1101_v53 = vrot.slane %v1100_v3, 2 }
 0x1f0   :  { %v2246_v4 = vpop.eup %2245  ;;  %v1102_v18 = vadd.f32 %v1101_v53, %v1100_v3  ;;  %v2212_v53 = vld [vmem:[%s3292_s15 + $0x28] sm:$0xff] }
 0x1f1   :  { %v1110_v20 = vmul.f32 %v2246_v4, %v1107_v60  ;;  %vm1116_vm0 = vweird.f32 %v2246_v4  ;;  %1435 = vmatpush.bf16.msrb.mxu2 %v2212_v53  ;;  %v2217_v53 = vld [vmem:[%s3296_s19 + $0x10] sm:$0xff] }
 0x1f2   :  { %v1103_v5 = vrot.slane %v1102_v18, 1  ;;  %vm1117_vm2 = vmor %vm1115_vm1, %vm1116_vm0 }
 0x1f3   :  { %v1111_v21 = vmul.f32 %v2246_v4, %v1110_v20 }
 0x1f4   :  { %v1104_v6 = vadd.f32 %v1103_v5, %v1102_v18  ;;  %v2211_v18 = vld [vmem:[%s3292_s15 + $0x20] sm:$0xff] }
 0x1f5   :  { %v1112_v58 = vmul.f32 0.5, %v1111_v21  ;;  %1436 = vmatpush.bf16.msrb.mxu2 %v2211_v18  ;;  %v2216_v18 = vld [vmem:[%s3296_s19 + $0x8] sm:$0xff] }
 0x1f6   :  { %v1106_v22 = vmul.f32 %v1104_v6, %v2569_v46  ;;  %v2210_v6 = vld [vmem:[%s3292_s15 + $0x18] sm:$0xff] }
 0x1f7   :  { %v1113_v7 = vsub.f32 1.5, %v1112_v58 }
 0x1f8   :  { %v1108_v8 = vadd.f32 1e-05, %v1106_v22 }
 0x1f9   :  { %v1114_v13 = vmul.f32 %v2246_v4, %v1113_v7  ;;  %1437 = vmatpush.bf16.msrb.mxu2 %v2210_v6 }
 0x1fa   :  { %2247 = vrsqrt.f32 %v1108_v8  ;;  %vm1125_vm4 = vweird.f32 %v1108_v8 }
 0x1fb   :  { %v1118_v15 = vsel %vm1117_vm2, %v2246_v4, %v1114_v13 }
 0x1fc   :  { %v1129_v16 = vmul.f32 %v1118_v15, %v3132_v54  ;;  %v1131_v24 = vmul.f32 %v1118_v15, %v3134_v50  ;;  %v1135_v54 = vperm.slane %v1065_v23, 1  ;;  %v2209_v23 = vld [vmem:[%s3292_s15 + $0x10] sm:$0xff]  ;;  %v2207_v15 = vld [vmem:[%s3292_s15] sm:$0xff] }
 0x1fd   :  { %1438 = vmatpush.bf16.msrb.mxu2 %v2209_v23 }
 0x1fe   :  { %v1138_v47 = vmul.f32 %v1134_v14, %v1129_v16  ;;  %v1140_v26 = vmul.f32 %v1134_v14, %v1131_v24 }
 0x200   :  { %v2248_v27 = vpop.eup %2247  ;;  %v1149_v36 = vadd.f32 %v1143_v25, %v1140_v26  ;;  %v1147_v37 = vadd.f32 %v1143_v25, %v1138_v47 }
 0x201   :  { %v1120_v51 = vmul.f32 %v2248_v27, %v1108_v8  ;;  %vm1126_vm3 = vweird.f32 %v2248_v27  ;;  %1439 = vmatpush.bf16.msrb.mxu2 %v2208_v9 }
 0x202   :  { %v1153_v62 = vmax.f32 %v1149_v36, 0.0  ;;  %v1151_v63 = vmax.f32 %v1147_v37, 0.0  ;;  %vm1127_vm5 = vmor %vm1125_vm4, %vm1126_vm3 }
 0x203   :  { %v1121_v28 = vmul.f32 %v2248_v27, %v1120_v51 }
 0x204   :  { %v1155_v0 = vpack.c.bf16 %v1153_v62, %v1151_v63  ;;  %v2227_v62 = vld [vmem:[%s3289_s13] ss:$0 sm:$0xff] }
 0x205   :  { %v1122_v1 = vmul.f32 0.5, %v1121_v28  ;;  %1440 = vmatpush.bf16.msrb.mxu2 %v2207_v15 }
 0x206   :  { %1297 = vmatmul.bf16.vlgmr.msrb.gmra.mxu0 %v1155_v0 }
 0x207   :  { %v1123_v29 = vsub.f32 1.5, %v1122_v1  ;;  %v2228_v1 = vld [vmem:[%s3290_s14] ss:$0 sm:$0xff] }
 0x209   :  { %v1124_v30 = vmul.f32 %v2248_v27, %v1123_v29 }
 0x20b   :  { %v1128_v50 = vsel %vm1127_vm5, %v2248_v27, %v1124_v30 }
 0x20c   :  { %v1130_v32 = vmul.f32 %v1128_v50, %v3165_v49  ;;  %v1132_v33 = vmul.f32 %v1128_v50, %v3167_v52 }
 0x20e   :  { %v1139_v35 = vmul.f32 %v1135_v54, %v1130_v32  ;;  %v1141_v39 = vmul.f32 %v1135_v54, %v1132_v33 }
 0x210   :  { %v1150_v31 = vadd.f32 %v1144_v34, %v1141_v39  ;;  %v1148_v19 = vadd.f32 %v1144_v34, %v1139_v35  ;;  %v2229_v39 = vld [vmem:[%s3291_s16] ss:$0 sm:$0xff] }
 0x212   :  { %v1154_v38 = vmax.f32 %v1150_v31, 0.0  ;;  %v1152_v40 = vmax.f32 %v1148_v19, 0.0 }
 0x214   :  { %v1156_v41 = vpack.c.bf16 %v1154_v38, %v1152_v40 }
 0x216   :  { %1311 = vmatmul.bf16.vlgmr.msrb.gmra.mxu1 %v1156_v41 }
 0x283   :  { %v1298_v42 = vpop.f32.mrf.mxu0 }
 0x284   :  { %v1299_v48 = vadd.f32 %v2226_v44, %v1298_v42  ;;  %v2222_v42 = vld [vmem:[%s3296_s19 + $0x38] sm:$0xff] }
 0x285   :  { %1563 = vmatpush.bf16.msrb.mxu3 %v2222_v42 }
 0x28b   :  { %v1300_v45 = vpop.f32.mrf.mxu0 }
 0x28c   :  { %v1301_v10 = vadd.f32 %v2226_v44, %v1300_v45  ;;  %v2221_v45 = vld [vmem:[%s3296_s19 + $0x30] sm:$0xff] }
 0x28d   :  { %1564 = vmatpush.bf16.msrb.mxu3 %v2221_v45 }
 0x293   :  { %v1312_v43 = vpop.f32.mrf.mxu1 }
 0x294   :  { %v1313_v52 = vadd.f32 %v1312_v43, %v1299_v48 }
 0x29b   :  { %v1314_v49 = vpop.f32.mrf.mxu1 }
 0x29c   :  { %v1315_v55 = vadd.f32 %v1314_v49, %v1301_v10  ;;  %v2220_v49 = vld [vmem:[%s3296_s19 + $0x28] sm:$0xff] }
 0x29d   :  { %1565 = vmatpush.bf16.msrb.mxu3 %v2220_v49 }
 0x29e   :  { %v1319_v56 = vadd.f32 %v1315_v55, %v1313_v52 }
 0x2a0   :  { %v1320_v57 = vrot.slane %v1319_v56, 4 }
 0x2a2   :  { %v1321_v60 = vadd.f32 %v1320_v57, %v1319_v56  ;;  %v2219_v56 = vld [vmem:[%s3296_s19 + $0x20] sm:$0xff] }
 0x2a3   :  { %1566 = vmatpush.bf16.msrb.mxu3 %v2219_v56 }
 0x2a4   :  { %v1322_v12 = vrot.slane %v1321_v60, 2 }
 0x2a6   :  { %v1323_v2 = vadd.f32 %v1322_v12, %v1321_v60 }
 0x2a7   :  { %1567 = vmatpush.bf16.msrb.mxu3 %v2218_v61 }
 0x2a8   :  { %v1324_v3 = vrot.slane %v1323_v2, 1 }
 0x2aa   :  { %v1325_v11 = vadd.f32 %v1324_v3, %v1323_v2 }
 0x2ab   :  { %1568 = vmatpush.bf16.msrb.mxu3 %v2217_v53 }
 0x2ac   :  { %v1326_v4 = vmul.f32 %v1325_v11, %v2569_v46 }
 0x2ae   :  { %v1327_v20 = vsub.f32 %v1313_v52, %v1326_v4  ;;  %v1328_v5 = vsub.f32 %v1315_v55, %v1326_v4 }
 0x2af   :  { %1569 = vmatpush.bf16.msrb.mxu3 %v2216_v18 }
 0x2b0   :  { %v1329_v17 = vmul.f32 %v1327_v20, %v1327_v20  ;;  %v1330_v21 = vmul.f32 %v1328_v5, %v1328_v5 }
 0x2b2   :  { %v1331_v58 = vadd.f32 %v1330_v21, %v1329_v17  ;;  %v2215_v17 = vld [vmem:[%s3296_s19] sm:$0xff] }
 0x2b3   :  { %1570 = vmatpush.bf16.msrb.mxu3 %v2215_v17 }
 0x2b4   :  { %v1332_v22 = vrot.slane %v1331_v58, 4 }
 0x2b6   :  { %v1333_v7 = vadd.f32 %v1332_v22, %v1331_v58 }
 0x2b8   :  { %v1334_v8 = vrot.slane %v1333_v7, 2 }
 0x2ba   :  { %v1335_v13 = vadd.f32 %v1334_v8, %v1333_v7 }
 0x2bc   :  { %v1336_v14 = vrot.slane %v1335_v13, 1 }
 0x2be   :  { %v1337_v16 = vadd.f32 %v1336_v14, %v1335_v13  ;;  %v2230_v14 = vld [vmem:[%s3293_s17] ss:$0 sm:$0xff] }
 0x2c0   :  { %v1338_v24 = vmul.f32 %v1337_v16, %v2569_v46 }
 0x2c2   :  { %v1339_v25 = vadd.f32 1e-05, %v1338_v24 }
 0x2c4   :  { %2249 = vrsqrt.f32 %v1339_v25  ;;  %vm1346_vm7 = vweird.f32 %v1339_v25 }
 0x2ca   :  { %v2250_v47 = vpop.eup %2249 }
 0x2cb   :  { %v1341_v26 = vmul.f32 %v2250_v47, %v1339_v25  ;;  %vm1347_vm6 = vweird.f32 %v2250_v47 }
 0x2cc   :  { %vm1348_vm8 = vmor %vm1346_vm7, %vm1347_vm6 }
 0x2cd   :  { %v1342_v27 = vmul.f32 %v2250_v47, %v1341_v26 }
 0x2cf   :  { %v1343_v36 = vmul.f32 0.5, %v1342_v27 }
 0x2d1   :  { %v1344_v37 = vsub.f32 1.5, %v1343_v36 }
 0x2d3   :  { %v1345_v51 = vmul.f32 %v2250_v47, %v1344_v37 }
 0x2d5   :  { %v1349_v63 = vsel %vm1348_vm8, %v2250_v47, %v1345_v51 }
 0x2d6   :  { %v1350_v28 = vmul.f32 %v1349_v63, %v1327_v20  ;;  %v1351_v0 = vmul.f32 %v1349_v63, %v1328_v5 }
 0x2d8   :  { %v1355_v29 = vmul.f32 %v2227_v62, %v1350_v28  ;;  %v1356_v30 = vmul.f32 %v2227_v62, %v1351_v0  ;;  %v2232_v62 = vld [vmem:[%s3295_s20] ss:$0 sm:$0xff] }
 0x2da   :  { %v1361_v54 = vadd.f32 %v2228_v1, %v1356_v30  ;;  %v1360_v50 = vadd.f32 %v2228_v1, %v1355_v29 }
 0x2dc   :  { %v1363_v32 = vmax.f32 %v1361_v54, 0.0  ;;  %v1362_v33 = vmax.f32 %v1360_v50, 0.0 }
 0x2de   :  { %v1364_v34 = vpack.c.bf16 %v1363_v32, %v1362_v33 }
 0x2e0   :  { %1441 = vmatmul.bf16.vlgmr.msrb.gmra.mxu2 %v1364_v34 }
 0x363   :  { %v1442_v35 = vpop.f32.mrf.mxu2 }
 0x364   :  { %v1443_v19 = vadd.f32 %v2229_v39, %v1442_v35 }
 0x36b   :  { %v1444_v31 = vpop.f32.mrf.mxu2 }
 0x36c   :  { %v1445_v38 = vadd.f32 %v2229_v39, %v1444_v31 }
 0x36e   :  { %v1449_v40 = vadd.f32 %v1445_v38, %v1443_v19 }
 0x370   :  { %v1450_v41 = vrot.slane %v1449_v40, 4 }
 0x372   :  { %v1451_v43 = vadd.f32 %v1450_v41, %v1449_v40 }
 0x374   :  { %v1452_v44 = vrot.slane %v1451_v43, 2 }
 0x376   :  { %v1453_v48 = vadd.f32 %v1452_v44, %v1451_v43 }
 0x378   :  { %v1454_v10 = vrot.slane %v1453_v48, 1 }
 0x37a   :  { %v1455_v52 = vadd.f32 %v1454_v10, %v1453_v48 }
 0x37c   :  { %v1456_v55 = vmul.f32 %v1455_v52, %v2569_v46 }
 0x37e   :  { %v1457_v57 = vsub.f32 %v1443_v19, %v1456_v55  ;;  %v1458_v59 = vsub.f32 %v1445_v38, %v1456_v55 }
 0x380   :  { %v1459_v60 = vmul.f32 %v1457_v57, %v1457_v57  ;;  %v1460_v12 = vmul.f32 %v1458_v59, %v1458_v59 }
 0x382   :  { %v1461_v2 = vadd.f32 %v1460_v12, %v1459_v60 }
 0x384   :  { %v1462_v3 = vrot.slane %v1461_v2, 4 }
 0x386   :  { %v1463_v11 = vadd.f32 %v1462_v3, %v1461_v2 }
 0x388   :  { %v1464_v4 = vrot.slane %v1463_v11, 2 }
 0x38a   :  { %v1465_v20 = vadd.f32 %v1464_v4, %v1463_v11 }
 0x38c   :  { %v1466_v5 = vrot.slane %v1465_v20, 1 }
 0x38e   :  { %v1467_v21 = vadd.f32 %v1466_v5, %v1465_v20 }
 0x390   :  { %v1468_v6 = vmul.f32 %v1467_v21, %v2569_v46  ;;  %v2231_v46 = vld [vmem:[%s3294_s18] ss:$0 sm:$0xff] }
 0x392   :  { %v1469_v58 = vadd.f32 1e-05, %v1468_v6 }
 0x394   :  { %2251 = vrsqrt.f32 %v1469_v58  ;;  %vm1476_vm10 = vweird.f32 %v1469_v58 }
 0x39a   :  { %v2252_v22 = vpop.eup %2251 }
 0x39b   :  { %v1471_v23 = vmul.f32 %v2252_v22, %v1469_v58  ;;  %vm1477_vm9 = vweird.f32 %v2252_v22 }
 0x39c   :  { %vm1478_vm11 = vmor %vm1476_vm10, %vm1477_vm9 }
 0x39d   :  { %v1472_v7 = vmul.f32 %v2252_v22, %v1471_v23 }
 0x39f   :  { %v1473_v8 = vmul.f32 0.5, %v1472_v7 }
 0x3a1   :  { %v1474_v9 = vsub.f32 1.5, %v1473_v8 }
 0x3a3   :  { %v1475_v13 = vmul.f32 %v2252_v22, %v1474_v9 }
 0x3a5   :  { %v1479_v15 = vsel %vm1478_vm11, %v2252_v22, %v1475_v13 }
 0x3a6   :  { %v1480_v16 = vmul.f32 %v1479_v15, %v1457_v57  ;;  %v1481_v24 = vmul.f32 %v1479_v15, %v1458_v59 }
 0x3a8   :  { %v1485_v25 = vmul.f32 %v2230_v14, %v1480_v16  ;;  %v1486_v47 = vmul.f32 %v2230_v14, %v1481_v24 }
 0x3aa   :  { %v1491_v26 = vadd.f32 %v2231_v46, %v1486_v47  ;;  %v1490_v27 = vadd.f32 %v2231_v46, %v1485_v25 }
 0x3ac   :  { %v1493_v36 = vmax.f32 %v1491_v26, 0.0  ;;  %v1492_v37 = vmax.f32 %v1490_v27, 0.0 }
 0x3ae   :  { %v1494_v51 = vpack.c.bf16 %v1493_v36, %v1492_v37 }
 0x3b0   :  { %1571 = vmatmul.bf16.vlgmr.msrb.gmra.mxu3 %v1494_v51 }
 0x433   :  { %v1572_v63 = vpop.f32.mrf.mxu3 }
 0x434   :  { %v1573_v28 = vadd.f32 %v2232_v62, %v1572_v63 }
 0x436   :  { %1577 = vst [vmem:[%s3297_s21] sm:$0xff] %v1573_v28 }
 0x43b   :  { %v1574_v0 = vpop.f32.mrf.mxu3 }
 0x43c   :  { %v1575_v1 = vadd.f32 %v2232_v62, %v1574_v0 }
 0x43e   :  { %1578 = vst [vmem:[%s3297_s21 + $0x8] sm:$0xff] %v1575_v1 }

</bundles_post_ra>
